<compile_context>
chip_gen: v7x
topology: tpu7x:2x2x1
jax: 0.10.0
libtpu: 0.0.40
codegen_flags: <defaults>
</compile_context>

<pallas_src>
import math
import functools

import jax
import jax.numpy as jnp
from jax import lax
from jax.experimental import pallas as pl
from jax.experimental.pallas import tpu as pltpu


# ----------------------------- in-kernel helpers -----------------------------

def _gelu(x):
    # exact (erf-based) GELU, matching torch.nn.GELU() default
    return 0.5 * x * (1.0 + lax.erf(x / math.sqrt(2.0)))


def _layernorm(x, g, b, eps=1e-5):
    mu = jnp.mean(x, axis=-1, keepdims=True)
    var = jnp.mean((x - mu) ** 2, axis=-1, keepdims=True)
    return (x - mu) * lax.rsqrt(var + eps) * g + b


# --------------------------------- the kernel --------------------------------

def _classifier_kernel(num_heads, head_dim, batch, seq_len,
                       x_ref, pe_ref, pool_ref,
                       we_ref, be_ref,
                       wqkv_ref, bqkv_ref,
                       wo_ref, bo_ref,
                       g1_ref, bt1_ref,
                       w1_ref, b1_ref, w2_ref, b2_ref,
                       g2_ref, bt2_ref,
                       wc1_ref, bc1_ref, wc2_ref, bc2_ref,
                       prob_ref, attn_ref):
    E = num_heads * head_dim
    cdt = we_ref.dtype                                   # matmul compute dtype (bf16)

    x = x_ref[...]                                       # (B*S, Din)  bf16

    # embedding + positional encoding (f32 accumulate)
    emb = jnp.dot(x, we_ref[...], preferred_element_type=jnp.float32) + be_ref[...]
    emb = emb + pe_ref[...]                              # (B*S, E)  f32

    # fused Q|K|V projection: one (B*S, E) x (E, 3E) matmul
    qkv = (jnp.dot(emb.astype(cdt), wqkv_ref[...],
                   preferred_element_type=jnp.float32) + bqkv_ref[...])   # (B*S, 3E) f32

    scale = 1.0 / math.sqrt(head_dim)
    q = (qkv[:, :E] * scale).astype(cdt)                 # scale hoisted onto q once
    k = qkv[:, E:2 * E].astype(cdt)
    v = qkv[:, 2 * E:].astype(cdt)

    mha_rows = []
    attn_rows = []
    for b in range(batch):                               # static unroll (small B)
        rs = slice(b * seq_len, (b + 1) * seq_len)
        qb, kb, vb = q[rs], k[rs], v[rs]                 # (S, E) each
        mha_b = jnp.zeros((seq_len, E), jnp.float32)
        w_heads = []
        for h in range(num_heads):                       # static unroll over heads
            cs = slice(h * head_dim, (h + 1) * head_dim)
            # scores = Q K^T / sqrt(d)  (contract on head_dim, no transpose)
            scores = lax.dot_general(qb[:, cs], kb[:, cs], (((1,), (1,)), ((), ())),
                                     preferred_element_type=jnp.float32)  # (S, S)
            m = jnp.max(scores, axis=-1, keepdims=True)
            p = jnp.exp(scores - m)
            w = p * pl.reciprocal(jnp.sum(p, axis=-1, keepdims=True), approx=True)
            # dropout(p=0.3) on the attention weights is identity in eval mode
            w_heads.append(w)
            ctx = jnp.dot(w.astype(cdt), vb[:, cs],
                          preferred_element_type=jnp.float32)             # (S, hd)
            # fold head context straight into the output projection (no concat)
            mha_b = mha_b + jnp.dot(ctx.astype(cdt), wo_ref[h],
                                    preferred_element_type=jnp.float32)   # (S, E)
        mha_rows.append(mha_b)
        attn_rows.append(jnp.concatenate(w_heads, axis=1))                # (S, H*S)

    # one wide store for all attention weights of the whole batch
    attn_ref[...] = jnp.concatenate(attn_rows, axis=0)                    # (B*S, H*S)

    mha = jnp.concatenate(mha_rows, axis=0) + bo_ref[...]                 # (B*S, E)

    # residual + layer norm 1
    x1 = _layernorm(mha + emb, g1_ref[...], bt1_ref[...])

    # FFN: Linear(E, 4E) -> GELU -> (Dropout=id) -> Linear(4E, E)
    hid = _gelu(jnp.dot(x1.astype(cdt), w1_ref[...],
                        preferred_element_type=jnp.float32) + b1_ref[...])
    ffn = jnp.dot(hid.astype(cdt), w2_ref[...],
                  preferred_element_type=jnp.float32) + b2_ref[...]

    # residual + layer norm 2
    x2 = _layernorm(ffn + x1, g2_ref[...], bt2_ref[...])

    # mean pool over sequence for every batch row at once (pooling matmul)
    pooled = jnp.dot(pool_ref[...], x2, preferred_element_type=jnp.float32)  # (B, E)

    # classifier head + sigmoid (all B rows, one store)
    c1 = _gelu(jnp.dot(pooled.astype(cdt), wc1_ref[...],
                       preferred_element_type=jnp.float32) + bc1_ref[...])   # (B, E//2)
    prob = jax.nn.sigmoid(jnp.dot(c1.astype(cdt), wc2_ref[...],
                                  preferred_element_type=jnp.float32) + bc2_ref[...])
    prob_ref[...] = prob                                                     # (B, 1)


# --------------------------------- wrapper -----------------------------------

def positional_encoding(seq_len, embed_dim):
    pos = jnp.arange(seq_len, dtype=jnp.float32)[:, None]
    div = jnp.exp(jnp.arange(0, embed_dim, 2, dtype=jnp.float32)
                  * (-math.log(10000.0) / embed_dim))
    pe = jnp.zeros((seq_len, embed_dim), jnp.float32)
    pe = pe.at[:, 0::2].set(jnp.sin(pos * div))
    pe = pe.at[:, 1::2].set(jnp.cos(pos * div))
    return pe


def timeseries_attention_classifier(x, params, num_heads,
                                    compute_dtype=jnp.bfloat16):
    B, S, Din = x.shape
    E = params["we"].shape[1]
    assert E % num_heads == 0
    hd = E // num_heads
    cdt = compute_dtype

    # constants built once in the wrapper
    pe_tiled = jnp.tile(positional_encoding(S, E), (B, 1))                 # (B*S, E)
    pool = jnp.repeat(jnp.eye(B, dtype=jnp.float32), S, axis=1) / float(S)  # (B, B*S)

    # pack weights: matmul operands -> bf16, biases / LN params stay f32
    weights = [
        params["we"].astype(cdt), params["be"],
        jnp.concatenate([params["wq"], params["wk"], params["wv"]], axis=1).astype(cdt),
        jnp.concatenate([params["bq"], params["bk"], params["bv"]], axis=1),
        params["wo"].reshape(num_heads, hd, E).astype(cdt), params["bo"],
        params["g1"], params["bt1"],
        params["w1"].astype(cdt), params["b1"],
        params["w2"].astype(cdt), params["b2"],
        params["g2"], params["bt2"],
        params["wc1"].astype(cdt), params["bc1"],
        params["wc2"].astype(cdt), params["bc2"],
    ]

    x_flat = x.reshape(B * S, Din).astype(cdt)
    in_arrays = [x_flat, pe_tiled, pool] + weights

    def full_spec(arr):
        n = arr.ndim
        return pl.BlockSpec(arr.shape, lambda i, n=n: (0,) * n)

    in_specs = [full_spec(a) for a in in_arrays]

    out_shape = (jax.ShapeDtypeStruct((B, 1), jnp.float32),
                 jax.ShapeDtypeStruct((B * S, num_heads * S), jnp.float32))
    out_specs = (pl.BlockSpec((B, 1), lambda i: (0, 0)),
                 pl.BlockSpec((B * S, num_heads * S), lambda i: (0, 0)))

    kernel = functools.partial(_classifier_kernel, num_heads, hd, B, S)
    prob, attn_flat = pl.pallas_call(
        kernel,
        grid=(1,),                      # whole batch in a single fat step
        in_specs=in_specs,
        out_specs=out_specs,
        out_shape=out_shape,
        compiler_params=pltpu.CompilerParams(dimension_semantics=("arbitrary",)),
    )(*in_arrays)

    # (B*S, H*S) -> (B, S, H, S) -> (B, H, S, S)   (free layout work in XLA)
    attn = attn_flat.reshape(B, S, num_heads, S).transpose(0, 2, 1, 3)
    return prob, attn                   # (B, 1) post-sigmoid probs, (B, H, S, S)


# ------------------------- deterministic parameter init ----------------------

def init_params(key, input_dim, embed_dim):
    def lin(k, fan_in, fan_out):
        kw, kb = jax.random.split(k)
        w = jax.random.normal(kw, (fan_in, fan_out), jnp.float32) * 0.05
        b = jax.random.normal(kb, (1, fan_out), jnp.float32) * 0.05
        return w, b

    ks = jax.random.split(key, 10)
    p = {}
    p["we"], p["be"] = lin(ks[0], input_dim, embed_dim)
    p["wq"], p["bq"] = lin(ks[1], embed_dim, embed_dim)
    p["wk"], p["bk"] = lin(ks[2], embed_dim, embed_dim)
    p["wv"], p["bv"] = lin(ks[3], embed_dim, embed_dim)
    p["wo"], p["bo"] = lin(ks[4], embed_dim, embed_dim)
    p["g1"], p["bt1"] = (jnp.ones((1, embed_dim), jnp.float32),
                         jnp.zeros((1, embed_dim), jnp.float32))
    p["w1"], p["b1"] = lin(ks[5], embed_dim, embed_dim * 4)
    p["w2"], p["b2"] = lin(ks[6], embed_dim * 4, embed_dim)
    p["g2"], p["bt2"] = (jnp.ones((1, embed_dim), jnp.float32),
                         jnp.zeros((1, embed_dim), jnp.float32))
    p["wc1"], p["bc1"] = lin(ks[7], embed_dim, embed_dim // 2)
    p["wc2"], p["bc2"] = lin(ks[8], embed_dim // 2, 1)
    return p


# ------------------------------ pure-JAX reference ---------------------------

def reference_forward(x, params, num_heads):
    B, S, Din = x.shape
    E = params["we"].shape[1]
    hd = E // num_heads
    pe = positional_encoding(S, E)

    emb = x @ params["we"] + params["be"] + pe
    q = emb @ params["wq"] + params["bq"]
    k = emb @ params["wk"] + params["bk"]
    v = emb @ params["wv"] + params["bv"]

    def split(t):
        return t.reshape(B, S, num_heads, hd).transpose(0, 2, 1, 3)

    Q, K, V = split(q), split(k), split(v)
    scores = jnp.einsum("bhqd,bhkd->bhqk", Q, K) / math.sqrt(hd)
    attn_w = jax.nn.softmax(scores, axis=-1)
    ao = jnp.einsum("bhqk,bhkd->bhqd", attn_w, V).transpose(0, 2, 1, 3).reshape(B, S, E)
    mha = ao @ params["wo"] + params["bo"]

    def ln(t, g, b, eps=1e-5):
        mu = jnp.mean(t, axis=-1, keepdims=True)
        var = jnp.mean((t - mu) ** 2, axis=-1, keepdims=True)
        return (t - mu) / jnp.sqrt(var + eps) * g + b

    def gelu(t):
        return 0.5 * t * (1.0 + lax.erf(t / math.sqrt(2.0)))

    x1 = ln(mha + emb, params["g1"], params["bt1"])
    ffn = gelu(x1 @ params["w1"] + params["b1"]) @ params["w2"] + params["b2"]
    x2 = ln(ffn + x1, params["g2"], params["bt2"])
    pooled = jnp.mean(x2, axis=1)
    c1 = gelu(pooled @ params["wc1"] + params["bc1"])
    probs = jax.nn.sigmoid(c1 @ params["wc2"] + params["bc2"])
    return probs, attn_w


# ------------------------------------ main ------------------------------------

if __name__ == "__main__":
    B, S, INPUT_DIM, EMBED_DIM, NUM_HEADS = 2, 8, 16, 32, 4

    key = jax.random.PRNGKey(0)
    kx, kp = jax.random.split(key)
    x = jax.random.normal(kx, (B, S, INPUT_DIM), jnp.float32)
    params = init_params(kp, INPUT_DIM, EMBED_DIM)

    probs, attn = timeseries_attention_classifier(x, params, NUM_HEADS)
    probs = jax.block_until_ready(probs)
    attn = jax.block_until_ready(attn)

    # sanity check against a pure-JAX f32 reference of the same math
    # (tolerances account for bf16 matmul inputs + approx EUP reciprocal)
    ref_probs, ref_attn = reference_forward(x, params, NUM_HEADS)
    assert probs.shape == (B, 1) and attn.shape == (B, NUM_HEADS, S, S)
    assert jnp.allclose(probs, ref_probs, rtol=5e-2, atol=2e-2)
    assert jnp.allclose(attn, ref_attn, rtol=5e-2, atol=2e-2)

    print("KERNEL_OK")
</pallas_src>

<mosaic_0001>
module attributes {stable_mosaic.version = 11 : i64} {
  func.func @_classifier_kernel(%arg0: i32, %arg1: memref<16x16xbf16, #tpu.memory_space<vmem>>, %arg2: memref<16x32xf32, #tpu.memory_space<vmem>>, %arg3: memref<2x16xf32, #tpu.memory_space<vmem>>, %arg4: memref<16x32xbf16, #tpu.memory_space<vmem>>, %arg5: memref<1x32xf32, #tpu.memory_space<vmem>>, %arg6: memref<32x96xbf16, #tpu.memory_space<vmem>>, %arg7: memref<1x96xf32, #tpu.memory_space<vmem>>, %arg8: memref<4x8x32xbf16, #tpu.memory_space<vmem>>, %arg9: memref<1x32xf32, #tpu.memory_space<vmem>>, %arg10: memref<1x32xf32, #tpu.memory_space<vmem>>, %arg11: memref<1x32xf32, #tpu.memory_space<vmem>>, %arg12: memref<32x128xbf16, #tpu.memory_space<vmem>>, %arg13: memref<1x128xf32, #tpu.memory_space<vmem>>, %arg14: memref<128x32xbf16, #tpu.memory_space<vmem>>, %arg15: memref<1x32xf32, #tpu.memory_space<vmem>>, %arg16: memref<1x32xf32, #tpu.memory_space<vmem>>, %arg17: memref<1x32xf32, #tpu.memory_space<vmem>>, %arg18: memref<32x16xbf16, #tpu.memory_space<vmem>>, %arg19: memref<1x16xf32, #tpu.memory_space<vmem>>, %arg20: memref<16x1xbf16, #tpu.memory_space<vmem>>, %arg21: memref<1x1xf32, #tpu.memory_space<vmem>>, %arg22: memref<2x1xf32, #tpu.memory_space<vmem>>, %arg23: memref<16x32xf32, #tpu.memory_space<vmem>>) attributes {dimension_semantics = [#tpu.dimension_semantics<arbitrary>], iteration_bounds = array<i64: 1>, scalar_prefetch = 0 : i64, scratch_operands = 0 : i64, tpu.core_type = #tpu.core_type<tc>, window_params = [{pipeline_mode = #tpu.pipeline_mode<synchronous>, transform_indices = @transform_0, window_bounds = array<i64: 16, 16>}, {pipeline_mode = #tpu.pipeline_mode<synchronous>, transform_indices = @transform_1, window_bounds = array<i64: 16, 32>}, {pipeline_mode = #tpu.pipeline_mode<synchronous>, transform_indices = @transform_2, window_bounds = array<i64: 2, 16>}, {pipeline_mode = #tpu.pipeline_mode<synchronous>, transform_indices = @transform_3, window_bounds = array<i64: 16, 32>}, {pipeline_mode = #tpu.pipeline_mode<synchronous>, transform_indices = @transform_4, window_bounds = array<i64: 1, 32>}, {pipeline_mode = #tpu.pipeline_mode<synchronous>, transform_indices = @transform_5, window_bounds = array<i64: 32, 96>}, {pipeline_mode = #tpu.pipeline_mode<synchronous>, transform_indices = @transform_6, window_bounds = array<i64: 1, 96>}, {pipeline_mode = #tpu.pipeline_mode<synchronous>, transform_indices = @transform_7, window_bounds = array<i64: 4, 8, 32>}, {pipeline_mode = #tpu.pipeline_mode<synchronous>, transform_indices = @transform_8, window_bounds = array<i64: 1, 32>}, {pipeline_mode = #tpu.pipeline_mode<synchronous>, transform_indices = @transform_9, window_bounds = array<i64: 1, 32>}, {pipeline_mode = #tpu.pipeline_mode<synchronous>, transform_indices = @transform_10, window_bounds = array<i64: 1, 32>}, {pipeline_mode = #tpu.pipeline_mode<synchronous>, transform_indices = @transform_11, window_bounds = array<i64: 32, 128>}, {pipeline_mode = #tpu.pipeline_mode<synchronous>, transform_indices = @transform_12, window_bounds = array<i64: 1, 128>}, {pipeline_mode = #tpu.pipeline_mode<synchronous>, transform_indices = @transform_13, window_bounds = array<i64: 128, 32>}, {pipeline_mode = #tpu.pipeline_mode<synchronous>, transform_indices = @transform_14, window_bounds = array<i64: 1, 32>}, {pipeline_mode = #tpu.pipeline_mode<synchronous>, transform_indices = @transform_15, window_bounds = array<i64: 1, 32>}, {pipeline_mode = #tpu.pipeline_mode<synchronous>, transform_indices = @transform_16, window_bounds = array<i64: 1, 32>}, {pipeline_mode = #tpu.pipeline_mode<synchronous>, transform_indices = @transform_17, window_bounds = array<i64: 32, 16>}, {pipeline_mode = #tpu.pipeline_mode<synchronous>, transform_indices = @transform_18, window_bounds = array<i64: 1, 16>}, {pipeline_mode = #tpu.pipeline_mode<synchronous>, transform_indices = @transform_19, window_bounds = array<i64: 16, 1>}, {pipeline_mode = #tpu.pipeline_mode<synchronous>, transform_indices = @transform_20, window_bounds = array<i64: 1, 1>}, {pipeline_mode = #tpu.pipeline_mode<synchronous>, transform_indices = @transform_21, window_bounds = array<i64: 2, 1>}, {pipeline_mode = #tpu.pipeline_mode<synchronous>, transform_indices = @transform_22, window_bounds = array<i64: 16, 32>}]} {
    %c0 = arith.constant 0 : index
    %c0_0 = arith.constant 0 : index
    %0 = vector.load %arg1[%c0, %c0_0] : memref<16x16xbf16, #tpu.memory_space<vmem>>, vector<16x16xbf16>
    %c0_1 = arith.constant 0 : index
    %c0_2 = arith.constant 0 : index
    %1 = vector.load %arg4[%c0_1, %c0_2] : memref<16x32xbf16, #tpu.memory_space<vmem>>, vector<16x32xbf16>
    %cst = arith.constant dense<0.000000e+00> : vector<16x32xf32>
    %2 = tpu.matmul %0, %1, %cst {dimension_numbers = #tpu.dot_dimension_numbers<[1], [0], [0], [1], [0, 0, 1, 1], [], []>} : vector<16x16xbf16>, vector<16x32xbf16>, vector<16x32xf32> -> vector<16x32xf32>
    %c0_3 = arith.constant 0 : index
    %c0_4 = arith.constant 0 : index
    %3 = vector.load %arg5[%c0_3, %c0_4] : memref<1x32xf32, #tpu.memory_space<vmem>>, vector<1x32xf32>
    %4 = vector.broadcast %3 : vector<1x32xf32> to vector<16x32xf32>
    %5 = arith.addf %2, %4 : vector<16x32xf32>
    %c0_5 = arith.constant 0 : index
    %c0_6 = arith.constant 0 : index
    %6 = vector.load %arg2[%c0_5, %c0_6] : memref<16x32xf32, #tpu.memory_space<vmem>>, vector<16x32xf32>
    %7 = arith.addf %5, %6 : vector<16x32xf32>
    %8 = arith.truncf %7 : vector<16x32xf32> to vector<16x32xbf16>
    %c0_7 = arith.constant 0 : index
    %c0_8 = arith.constant 0 : index
    %9 = vector.load %arg6[%c0_7, %c0_8] : memref<32x96xbf16, #tpu.memory_space<vmem>>, vector<32x96xbf16>
    %cst_9 = arith.constant dense<0.000000e+00> : vector<16x96xf32>
    %10 = tpu.matmul %8, %9, %cst_9 {dimension_numbers = #tpu.dot_dimension_numbers<[1], [0], [0], [1], [0, 0, 1, 1], [], []>} : vector<16x32xbf16>, vector<32x96xbf16>, vector<16x96xf32> -> vector<16x96xf32>
    %c0_10 = arith.constant 0 : index
    %c0_11 = arith.constant 0 : index
    %11 = vector.load %arg7[%c0_10, %c0_11] : memref<1x96xf32, #tpu.memory_space<vmem>>, vector<1x96xf32>
    %12 = vector.broadcast %11 : vector<1x96xf32> to vector<16x96xf32>
    %13 = arith.addf %10, %12 : vector<16x96xf32>
    %14 = vector.extract_strided_slice %13 {offsets = [0, 0], sizes = [16, 32], strides = [1, 1]} : vector<16x96xf32> to vector<16x32xf32>
    %cst_12 = arith.constant 0.353553385 : f32
    %15 = vector.broadcast %cst_12 : f32 to vector<16x32xf32>
    %16 = arith.mulf %14, %15 : vector<16x32xf32>
    %17 = arith.truncf %16 : vector<16x32xf32> to vector<16x32xbf16>
    %18 = vector.extract_strided_slice %13 {offsets = [0, 32], sizes = [16, 32], strides = [1, 1]} : vector<16x96xf32> to vector<16x32xf32>
    %19 = arith.truncf %18 : vector<16x32xf32> to vector<16x32xbf16>
    %20 = vector.extract_strided_slice %13 {offsets = [0, 64], sizes = [16, 32], strides = [1, 1]} : vector<16x96xf32> to vector<16x32xf32>
    %21 = arith.truncf %20 : vector<16x32xf32> to vector<16x32xbf16>
    %22 = vector.extract_strided_slice %17 {offsets = [0, 0], sizes = [8, 32], strides = [1, 1]} : vector<16x32xbf16> to vector<8x32xbf16>
    %23 = vector.extract_strided_slice %19 {offsets = [0, 0], sizes = [8, 32], strides = [1, 1]} : vector<16x32xbf16> to vector<8x32xbf16>
    %24 = vector.extract_strided_slice %21 {offsets = [0, 0], sizes = [8, 32], strides = [1, 1]} : vector<16x32xbf16> to vector<8x32xbf16>
    %cst_13 = arith.constant 0.000000e+00 : f32
    %25 = vector.broadcast %cst_13 : f32 to vector<8x32xf32>
    %26 = vector.extract_strided_slice %22 {offsets = [0, 0], sizes = [8, 8], strides = [1, 1]} : vector<8x32xbf16> to vector<8x8xbf16>
    %27 = vector.extract_strided_slice %23 {offsets = [0, 0], sizes = [8, 8], strides = [1, 1]} : vector<8x32xbf16> to vector<8x8xbf16>
    %cst_14 = arith.constant dense<0.000000e+00> : vector<8x8xf32>
    %28 = tpu.matmul %26, %27, %cst_14 {dimension_numbers = #tpu.dot_dimension_numbers<[1], [1], [0], [0], [0, 0, 1, 0], [], []>} : vector<8x8xbf16>, vector<8x8xbf16>, vector<8x8xf32> -> vector<8x8xf32>
    %cst_15 = arith.constant dense<0xFF800000> : vector<8xf32>
    %29 = vector.multi_reduction <maximumf>, %28, %cst_15 [1] : vector<8x8xf32> to vector<8xf32>
    %30 = vector.shape_cast %29 : vector<8xf32> to vector<8x1xf32>
    %31 = vector.broadcast %30 : vector<8x1xf32> to vector<8x8xf32>
    %32 = arith.subf %28, %31 : vector<8x8xf32>
    %33 = math.exp %32 : vector<8x8xf32>
    %cst_16 = arith.constant dense<0.000000e+00> : vector<8xf32>
    %34 = vector.multi_reduction <add>, %33, %cst_16 [1] : vector<8x8xf32> to vector<8xf32>
    %35 = vector.shape_cast %34 : vector<8xf32> to vector<8x1xf32>
    %36 = tpu.reciprocal %35 {approx = true} : vector<8x1xf32> -> vector<8x1xf32>
    %37 = vector.broadcast %36 : vector<8x1xf32> to vector<8x8xf32>
    %38 = arith.mulf %33, %37 : vector<8x8xf32>
    %39 = arith.truncf %38 : vector<8x8xf32> to vector<8x8xbf16>
    %40 = vector.extract_strided_slice %24 {offsets = [0, 0], sizes = [8, 8], strides = [1, 1]} : vector<8x32xbf16> to vector<8x8xbf16>
    %cst_17 = arith.constant dense<0.000000e+00> : vector<8x8xf32>
    %41 = tpu.matmul %39, %40, %cst_17 {dimension_numbers = #tpu.dot_dimension_numbers<[1], [0], [0], [1], [0, 0, 1, 1], [], []>} : vector<8x8xbf16>, vector<8x8xbf16>, vector<8x8xf32> -> vector<8x8xf32>
    %42 = arith.truncf %41 : vector<8x8xf32> to vector<8x8xbf16>
    %c0_18 = arith.constant 0 : index
    %c0_19 = arith.constant 0 : index
    %c0_20 = arith.constant 0 : index
    %43 = vector.load %arg8[%c0_18, %c0_19, %c0_20] : memref<4x8x32xbf16, #tpu.memory_space<vmem>>, vector<1x8x32xbf16>
    %44 = vector.shape_cast %43 : vector<1x8x32xbf16> to vector<8x32xbf16>
    %cst_21 = arith.constant dense<0.000000e+00> : vector<8x32xf32>
    %45 = tpu.matmul %42, %44, %cst_21 {dimension_numbers = #tpu.dot_dimension_numbers<[1], [0], [0], [1], [0, 0, 1, 1], [], []>} : vector<8x8xbf16>, vector<8x32xbf16>, vector<8x32xf32> -> vector<8x32xf32>
    %46 = arith.addf %25, %45 : vector<8x32xf32>
    %47 = vector.extract_strided_slice %22 {offsets = [0, 8], sizes = [8, 8], strides = [1, 1]} : vector<8x32xbf16> to vector<8x8xbf16>
    %48 = vector.extract_strided_slice %23 {offsets = [0, 8], sizes = [8, 8], strides = [1, 1]} : vector<8x32xbf16> to vector<8x8xbf16>
    %cst_22 = arith.constant dense<0.000000e+00> : vector<8x8xf32>
    %49 = tpu.matmul %47, %48, %cst_22 {dimension_numbers = #tpu.dot_dimension_numbers<[1], [1], [0], [0], [0, 0, 1, 0], [], []>} : vector<8x8xbf16>, vector<8x8xbf16>, vector<8x8xf32> -> vector<8x8xf32>
    %cst_23 = arith.constant dense<0xFF800000> : vector<8xf32>
    %50 = vector.multi_reduction <maximumf>, %49, %cst_23 [1] : vector<8x8xf32> to vector<8xf32>
    %51 = vector.shape_cast %50 : vector<8xf32> to vector<8x1xf32>
    %52 = vector.broadcast %51 : vector<8x1xf32> to vector<8x8xf32>
    %53 = arith.subf %49, %52 : vector<8x8xf32>
    %54 = math.exp %53 : vector<8x8xf32>
    %cst_24 = arith.constant dense<0.000000e+00> : vector<8xf32>
    %55 = vector.multi_reduction <add>, %54, %cst_24 [1] : vector<8x8xf32> to vector<8xf32>
    %56 = vector.shape_cast %55 : vector<8xf32> to vector<8x1xf32>
    %57 = tpu.reciprocal %56 {approx = true} : vector<8x1xf32> -> vector<8x1xf32>
    %58 = vector.broadcast %57 : vector<8x1xf32> to vector<8x8xf32>
    %59 = arith.mulf %54, %58 : vector<8x8xf32>
    %60 = arith.truncf %59 : vector<8x8xf32> to vector<8x8xbf16>
    %61 = vector.extract_strided_slice %24 {offsets = [0, 8], sizes = [8, 8], strides = [1, 1]} : vector<8x32xbf16> to vector<8x8xbf16>
    %cst_25 = arith.constant dense<0.000000e+00> : vector<8x8xf32>
    %62 = tpu.matmul %60, %61, %cst_25 {dimension_numbers = #tpu.dot_dimension_numbers<[1], [0], [0], [1], [0, 0, 1, 1], [], []>} : vector<8x8xbf16>, vector<8x8xbf16>, vector<8x8xf32> -> vector<8x8xf32>
    %63 = arith.truncf %62 : vector<8x8xf32> to vector<8x8xbf16>
    %c1 = arith.constant 1 : index
    %c0_26 = arith.constant 0 : index
    %c0_27 = arith.constant 0 : index
    %64 = vector.load %arg8[%c1, %c0_26, %c0_27] : memref<4x8x32xbf16, #tpu.memory_space<vmem>>, vector<1x8x32xbf16>
    %65 = vector.shape_cast %64 : vector<1x8x32xbf16> to vector<8x32xbf16>
    %cst_28 = arith.constant dense<0.000000e+00> : vector<8x32xf32>
    %66 = tpu.matmul %63, %65, %cst_28 {dimension_numbers = #tpu.dot_dimension_numbers<[1], [0], [0], [1], [0, 0, 1, 1], [], []>} : vector<8x8xbf16>, vector<8x32xbf16>, vector<8x32xf32> -> vector<8x32xf32>
    %67 = arith.addf %46, %66 : vector<8x32xf32>
    %68 = vector.extract_strided_slice %22 {offsets = [0, 16], sizes = [8, 8], strides = [1, 1]} : vector<8x32xbf16> to vector<8x8xbf16>
    %69 = vector.extract_strided_slice %23 {offsets = [0, 16], sizes = [8, 8], strides = [1, 1]} : vector<8x32xbf16> to vector<8x8xbf16>
    %cst_29 = arith.constant dense<0.000000e+00> : vector<8x8xf32>
    %70 = tpu.matmul %68, %69, %cst_29 {dimension_numbers = #tpu.dot_dimension_numbers<[1], [1], [0], [0], [0, 0, 1, 0], [], []>} : vector<8x8xbf16>, vector<8x8xbf16>, vector<8x8xf32> -> vector<8x8xf32>
    %cst_30 = arith.constant dense<0xFF800000> : vector<8xf32>
    %71 = vector.multi_reduction <maximumf>, %70, %cst_30 [1] : vector<8x8xf32> to vector<8xf32>
    %72 = vector.shape_cast %71 : vector<8xf32> to vector<8x1xf32>
    %73 = vector.broadcast %72 : vector<8x1xf32> to vector<8x8xf32>
    %74 = arith.subf %70, %73 : vector<8x8xf32>
    %75 = math.exp %74 : vector<8x8xf32>
    %cst_31 = arith.constant dense<0.000000e+00> : vector<8xf32>
    %76 = vector.multi_reduction <add>, %75, %cst_31 [1] : vector<8x8xf32> to vector<8xf32>
    %77 = vector.shape_cast %76 : vector<8xf32> to vector<8x1xf32>
    %78 = tpu.reciprocal %77 {approx = true} : vector<8x1xf32> -> vector<8x1xf32>
    %79 = vector.broadcast %78 : vector<8x1xf32> to vector<8x8xf32>
    %80 = arith.mulf %75, %79 : vector<8x8xf32>
    %81 = arith.truncf %80 : vector<8x8xf32> to vector<8x8xbf16>
    %82 = vector.extract_strided_slice %24 {offsets = [0, 16], sizes = [8, 8], strides = [1, 1]} : vector<8x32xbf16> to vector<8x8xbf16>
    %cst_32 = arith.constant dense<0.000000e+00> : vector<8x8xf32>
    %83 = tpu.matmul %81, %82, %cst_32 {dimension_numbers = #tpu.dot_dimension_numbers<[1], [0], [0], [1], [0, 0, 1, 1], [], []>} : vector<8x8xbf16>, vector<8x8xbf16>, vector<8x8xf32> -> vector<8x8xf32>
    %84 = arith.truncf %83 : vector<8x8xf32> to vector<8x8xbf16>
    %c2 = arith.constant 2 : index
    %c0_33 = arith.constant 0 : index
    %c0_34 = arith.constant 0 : index
    %85 = vector.load %arg8[%c2, %c0_33, %c0_34] : memref<4x8x32xbf16, #tpu.memory_space<vmem>>, vector<1x8x32xbf16>
    %86 = vector.shape_cast %85 : vector<1x8x32xbf16> to vector<8x32xbf16>
    %cst_35 = arith.constant dense<0.000000e+00> : vector<8x32xf32>
    %87 = tpu.matmul %84, %86, %cst_35 {dimension_numbers = #tpu.dot_dimension_numbers<[1], [0], [0], [1], [0, 0, 1, 1], [], []>} : vector<8x8xbf16>, vector<8x32xbf16>, vector<8x32xf32> -> vector<8x32xf32>
    %88 = arith.addf %67, %87 : vector<8x32xf32>
    %89 = vector.extract_strided_slice %22 {offsets = [0, 24], sizes = [8, 8], strides = [1, 1]} : vector<8x32xbf16> to vector<8x8xbf16>
    %90 = vector.extract_strided_slice %23 {offsets = [0, 24], sizes = [8, 8], strides = [1, 1]} : vector<8x32xbf16> to vector<8x8xbf16>
    %cst_36 = arith.constant dense<0.000000e+00> : vector<8x8xf32>
    %91 = tpu.matmul %89, %90, %cst_36 {dimension_numbers = #tpu.dot_dimension_numbers<[1], [1], [0], [0], [0, 0, 1, 0], [], []>} : vector<8x8xbf16>, vector<8x8xbf16>, vector<8x8xf32> -> vector<8x8xf32>
    %cst_37 = arith.constant dense<0xFF800000> : vector<8xf32>
    %92 = vector.multi_reduction <maximumf>, %91, %cst_37 [1] : vector<8x8xf32> to vector<8xf32>
    %93 = vector.shape_cast %92 : vector<8xf32> to vector<8x1xf32>
    %94 = vector.broadcast %93 : vector<8x1xf32> to vector<8x8xf32>
    %95 = arith.subf %91, %94 : vector<8x8xf32>
    %96 = math.exp %95 : vector<8x8xf32>
    %cst_38 = arith.constant dense<0.000000e+00> : vector<8xf32>
    %97 = vector.multi_reduction <add>, %96, %cst_38 [1] : vector<8x8xf32> to vector<8xf32>
    %98 = vector.shape_cast %97 : vector<8xf32> to vector<8x1xf32>
    %99 = tpu.reciprocal %98 {approx = true} : vector<8x1xf32> -> vector<8x1xf32>
    %100 = vector.broadcast %99 : vector<8x1xf32> to vector<8x8xf32>
    %101 = arith.mulf %96, %100 : vector<8x8xf32>
    %102 = arith.truncf %101 : vector<8x8xf32> to vector<8x8xbf16>
    %103 = vector.extract_strided_slice %24 {offsets = [0, 24], sizes = [8, 8], strides = [1, 1]} : vector<8x32xbf16> to vector<8x8xbf16>
    %cst_39 = arith.constant dense<0.000000e+00> : vector<8x8xf32>
    %104 = tpu.matmul %102, %103, %cst_39 {dimension_numbers = #tpu.dot_dimension_numbers<[1], [0], [0], [1], [0, 0, 1, 1], [], []>} : vector<8x8xbf16>, vector<8x8xbf16>, vector<8x8xf32> -> vector<8x8xf32>
    %105 = arith.truncf %104 : vector<8x8xf32> to vector<8x8xbf16>
    %c3 = arith.constant 3 : index
    %c0_40 = arith.constant 0 : index
    %c0_41 = arith.constant 0 : index
    %106 = vector.load %arg8[%c3, %c0_40, %c0_41] : memref<4x8x32xbf16, #tpu.memory_space<vmem>>, vector<1x8x32xbf16>
    %107 = vector.shape_cast %106 : vector<1x8x32xbf16> to vector<8x32xbf16>
    %cst_42 = arith.constant dense<0.000000e+00> : vector<8x32xf32>
    %108 = tpu.matmul %105, %107, %cst_42 {dimension_numbers = #tpu.dot_dimension_numbers<[1], [0], [0], [1], [0, 0, 1, 1], [], []>} : vector<8x8xbf16>, vector<8x32xbf16>, vector<8x32xf32> -> vector<8x32xf32>
    %109 = arith.addf %88, %108 : vector<8x32xf32>
    %110 = tpu.concatenate %38, %59, %80, %101 in 1 : vector<8x8xf32>, vector<8x8xf32>, vector<8x8xf32>, vector<8x8xf32> -> vector<8x32xf32>
    %111 = vector.extract_strided_slice %17 {offsets = [8, 0], sizes = [8, 32], strides = [1, 1]} : vector<16x32xbf16> to vector<8x32xbf16>
    %112 = vector.extract_strided_slice %19 {offsets = [8, 0], sizes = [8, 32], strides = [1, 1]} : vector<16x32xbf16> to vector<8x32xbf16>
    %113 = vector.extract_strided_slice %21 {offsets = [8, 0], sizes = [8, 32], strides = [1, 1]} : vector<16x32xbf16> to vector<8x32xbf16>
    %cst_43 = arith.constant 0.000000e+00 : f32
    %114 = vector.broadcast %cst_43 : f32 to vector<8x32xf32>
    %115 = vector.extract_strided_slice %111 {offsets = [0, 0], sizes = [8, 8], strides = [1, 1]} : vector<8x32xbf16> to vector<8x8xbf16>
    %116 = vector.extract_strided_slice %112 {offsets = [0, 0], sizes = [8, 8], strides = [1, 1]} : vector<8x32xbf16> to vector<8x8xbf16>
    %cst_44 = arith.constant dense<0.000000e+00> : vector<8x8xf32>
    %117 = tpu.matmul %115, %116, %cst_44 {dimension_numbers = #tpu.dot_dimension_numbers<[1], [1], [0], [0], [0, 0, 1, 0], [], []>} : vector<8x8xbf16>, vector<8x8xbf16>, vector<8x8xf32> -> vector<8x8xf32>
    %cst_45 = arith.constant dense<0xFF800000> : vector<8xf32>
    %118 = vector.multi_reduction <maximumf>, %117, %cst_45 [1] : vector<8x8xf32> to vector<8xf32>
    %119 = vector.shape_cast %118 : vector<8xf32> to vector<8x1xf32>
    %120 = vector.broadcast %119 : vector<8x1xf32> to vector<8x8xf32>
    %121 = arith.subf %117, %120 : vector<8x8xf32>
    %122 = math.exp %121 : vector<8x8xf32>
    %cst_46 = arith.constant dense<0.000000e+00> : vector<8xf32>
    %123 = vector.multi_reduction <add>, %122, %cst_46 [1] : vector<8x8xf32> to vector<8xf32>
    %124 = vector.shape_cast %123 : vector<8xf32> to vector<8x1xf32>
    %125 = tpu.reciprocal %124 {approx = true} : vector<8x1xf32> -> vector<8x1xf32>
    %126 = vector.broadcast %125 : vector<8x1xf32> to vector<8x8xf32>
    %127 = arith.mulf %122, %126 : vector<8x8xf32>
    %128 = arith.truncf %127 : vector<8x8xf32> to vector<8x8xbf16>
    %129 = vector.extract_strided_slice %113 {offsets = [0, 0], sizes = [8, 8], strides = [1, 1]} : vector<8x32xbf16> to vector<8x8xbf16>
    %cst_47 = arith.constant dense<0.000000e+00> : vector<8x8xf32>
    %130 = tpu.matmul %128, %129, %cst_47 {dimension_numbers = #tpu.dot_dimension_numbers<[1], [0], [0], [1], [0, 0, 1, 1], [], []>} : vector<8x8xbf16>, vector<8x8xbf16>, vector<8x8xf32> -> vector<8x8xf32>
    %131 = arith.truncf %130 : vector<8x8xf32> to vector<8x8xbf16>
    %c0_48 = arith.constant 0 : index
    %c0_49 = arith.constant 0 : index
    %c0_50 = arith.constant 0 : index
    %132 = vector.load %arg8[%c0_48, %c0_49, %c0_50] : memref<4x8x32xbf16, #tpu.memory_space<vmem>>, vector<1x8x32xbf16>
    %133 = vector.shape_cast %132 : vector<1x8x32xbf16> to vector<8x32xbf16>
    %cst_51 = arith.constant dense<0.000000e+00> : vector<8x32xf32>
    %134 = tpu.matmul %131, %133, %cst_51 {dimension_numbers = #tpu.dot_dimension_numbers<[1], [0], [0], [1], [0, 0, 1, 1], [], []>} : vector<8x8xbf16>, vector<8x32xbf16>, vector<8x32xf32> -> vector<8x32xf32>
    %135 = arith.addf %114, %134 : vector<8x32xf32>
    %136 = vector.extract_strided_slice %111 {offsets = [0, 8], sizes = [8, 8], strides = [1, 1]} : vector<8x32xbf16> to vector<8x8xbf16>
    %137 = vector.extract_strided_slice %112 {offsets = [0, 8], sizes = [8, 8], strides = [1, 1]} : vector<8x32xbf16> to vector<8x8xbf16>
    %cst_52 = arith.constant dense<0.000000e+00> : vector<8x8xf32>
    %138 = tpu.matmul %136, %137, %cst_52 {dimension_numbers = #tpu.dot_dimension_numbers<[1], [1], [0], [0], [0, 0, 1, 0], [], []>} : vector<8x8xbf16>, vector<8x8xbf16>, vector<8x8xf32> -> vector<8x8xf32>
    %cst_53 = arith.constant dense<0xFF800000> : vector<8xf32>
    %139 = vector.multi_reduction <maximumf>, %138, %cst_53 [1] : vector<8x8xf32> to vector<8xf32>
    %140 = vector.shape_cast %139 : vector<8xf32> to vector<8x1xf32>
    %141 = vector.broadcast %140 : vector<8x1xf32> to vector<8x8xf32>
    %142 = arith.subf %138, %141 : vector<8x8xf32>
    %143 = math.exp %142 : vector<8x8xf32>
    %cst_54 = arith.constant dense<0.000000e+00> : vector<8xf32>
    %144 = vector.multi_reduction <add>, %143, %cst_54 [1] : vector<8x8xf32> to vector<8xf32>
    %145 = vector.shape_cast %144 : vector<8xf32> to vector<8x1xf32>
    %146 = tpu.reciprocal %145 {approx = true} : vector<8x1xf32> -> vector<8x1xf32>
    %147 = vector.broadcast %146 : vector<8x1xf32> to vector<8x8xf32>
    %148 = arith.mulf %143, %147 : vector<8x8xf32>
    %149 = arith.truncf %148 : vector<8x8xf32> to vector<8x8xbf16>
    %150 = vector.extract_strided_slice %113 {offsets = [0, 8], sizes = [8, 8], strides = [1, 1]} : vector<8x32xbf16> to vector<8x8xbf16>
    %cst_55 = arith.constant dense<0.000000e+00> : vector<8x8xf32>
    %151 = tpu.matmul %149, %150, %cst_55 {dimension_numbers = #tpu.dot_dimension_numbers<[1], [0], [0], [1], [0, 0, 1, 1], [], []>} : vector<8x8xbf16>, vector<8x8xbf16>, vector<8x8xf32> -> vector<8x8xf32>
    %152 = arith.truncf %151 : vector<8x8xf32> to vector<8x8xbf16>
    %c1_56 = arith.constant 1 : index
    %c0_57 = arith.constant 0 : index
    %c0_58 = arith.constant 0 : index
    %153 = vector.load %arg8[%c1_56, %c0_57, %c0_58] : memref<4x8x32xbf16, #tpu.memory_space<vmem>>, vector<1x8x32xbf16>
    %154 = vector.shape_cast %153 : vector<1x8x32xbf16> to vector<8x32xbf16>
    %cst_59 = arith.constant dense<0.000000e+00> : vector<8x32xf32>
    %155 = tpu.matmul %152, %154, %cst_59 {dimension_numbers = #tpu.dot_dimension_numbers<[1], [0], [0], [1], [0, 0, 1, 1], [], []>} : vector<8x8xbf16>, vector<8x32xbf16>, vector<8x32xf32> -> vector<8x32xf32>
    %156 = arith.addf %135, %155 : vector<8x32xf32>
    %157 = vector.extract_strided_slice %111 {offsets = [0, 16], sizes = [8, 8], strides = [1, 1]} : vector<8x32xbf16> to vector<8x8xbf16>
    %158 = vector.extract_strided_slice %112 {offsets = [0, 16], sizes = [8, 8], strides = [1, 1]} : vector<8x32xbf16> to vector<8x8xbf16>
    %cst_60 = arith.constant dense<0.000000e+00> : vector<8x8xf32>
    %159 = tpu.matmul %157, %158, %cst_60 {dimension_numbers = #tpu.dot_dimension_numbers<[1], [1], [0], [0], [0, 0, 1, 0], [], []>} : vector<8x8xbf16>, vector<8x8xbf16>, vector<8x8xf32> -> vector<8x8xf32>
    %cst_61 = arith.constant dense<0xFF800000> : vector<8xf32>
    %160 = vector.multi_reduction <maximumf>, %159, %cst_61 [1] : vector<8x8xf32> to vector<8xf32>
    %161 = vector.shape_cast %160 : vector<8xf32> to vector<8x1xf32>
    %162 = vector.broadcast %161 : vector<8x1xf32> to vector<8x8xf32>
    %163 = arith.subf %159, %162 : vector<8x8xf32>
    %164 = math.exp %163 : vector<8x8xf32>
    %cst_62 = arith.constant dense<0.000000e+00> : vector<8xf32>
    %165 = vector.multi_reduction <add>, %164, %cst_62 [1] : vector<8x8xf32> to vector<8xf32>
    %166 = vector.shape_cast %165 : vector<8xf32> to vector<8x1xf32>
    %167 = tpu.reciprocal %166 {approx = true} : vector<8x1xf32> -> vector<8x1xf32>
    %168 = vector.broadcast %167 : vector<8x1xf32> to vector<8x8xf32>
    %169 = arith.mulf %164, %168 : vector<8x8xf32>
    %170 = arith.truncf %169 : vector<8x8xf32> to vector<8x8xbf16>
    %171 = vector.extract_strided_slice %113 {offsets = [0, 16], sizes = [8, 8], strides = [1, 1]} : vector<8x32xbf16> to vector<8x8xbf16>
    %cst_63 = arith.constant dense<0.000000e+00> : vector<8x8xf32>
    %172 = tpu.matmul %170, %171, %cst_63 {dimension_numbers = #tpu.dot_dimension_numbers<[1], [0], [0], [1], [0, 0, 1, 1], [], []>} : vector<8x8xbf16>, vector<8x8xbf16>, vector<8x8xf32> -> vector<8x8xf32>
    %173 = arith.truncf %172 : vector<8x8xf32> to vector<8x8xbf16>
    %c2_64 = arith.constant 2 : index
    %c0_65 = arith.constant 0 : index
    %c0_66 = arith.constant 0 : index
    %174 = vector.load %arg8[%c2_64, %c0_65, %c0_66] : memref<4x8x32xbf16, #tpu.memory_space<vmem>>, vector<1x8x32xbf16>
    %175 = vector.shape_cast %174 : vector<1x8x32xbf16> to vector<8x32xbf16>
    %cst_67 = arith.constant dense<0.000000e+00> : vector<8x32xf32>
    %176 = tpu.matmul %173, %175, %cst_67 {dimension_numbers = #tpu.dot_dimension_numbers<[1], [0], [0], [1], [0, 0, 1, 1], [], []>} : vector<8x8xbf16>, vector<8x32xbf16>, vector<8x32xf32> -> vector<8x32xf32>
    %177 = arith.addf %156, %176 : vector<8x32xf32>
    %178 = vector.extract_strided_slice %111 {offsets = [0, 24], sizes = [8, 8], strides = [1, 1]} : vector<8x32xbf16> to vector<8x8xbf16>
    %179 = vector.extract_strided_slice %112 {offsets = [0, 24], sizes = [8, 8], strides = [1, 1]} : vector<8x32xbf16> to vector<8x8xbf16>
    %cst_68 = arith.constant dense<0.000000e+00> : vector<8x8xf32>
    %180 = tpu.matmul %178, %179, %cst_68 {dimension_numbers = #tpu.dot_dimension_numbers<[1], [1], [0], [0], [0, 0, 1, 0], [], []>} : vector<8x8xbf16>, vector<8x8xbf16>, vector<8x8xf32> -> vector<8x8xf32>
    %cst_69 = arith.constant dense<0xFF800000> : vector<8xf32>
    %181 = vector.multi_reduction <maximumf>, %180, %cst_69 [1] : vector<8x8xf32> to vector<8xf32>
    %182 = vector.shape_cast %181 : vector<8xf32> to vector<8x1xf32>
    %183 = vector.broadcast %182 : vector<8x1xf32> to vector<8x8xf32>
    %184 = arith.subf %180, %183 : vector<8x8xf32>
    %185 = math.exp %184 : vector<8x8xf32>
    %cst_70 = arith.constant dense<0.000000e+00> : vector<8xf32>
    %186 = vector.multi_reduction <add>, %185, %cst_70 [1] : vector<8x8xf32> to vector<8xf32>
    %187 = vector.shape_cast %186 : vector<8xf32> to vector<8x1xf32>
    %188 = tpu.reciprocal %187 {approx = true} : vector<8x1xf32> -> vector<8x1xf32>
    %189 = vector.broadcast %188 : vector<8x1xf32> to vector<8x8xf32>
    %190 = arith.mulf %185, %189 : vector<8x8xf32>
    %191 = arith.truncf %190 : vector<8x8xf32> to vector<8x8xbf16>
    %192 = vector.extract_strided_slice %113 {offsets = [0, 24], sizes = [8, 8], strides = [1, 1]} : vector<8x32xbf16> to vector<8x8xbf16>
    %cst_71 = arith.constant dense<0.000000e+00> : vector<8x8xf32>
    %193 = tpu.matmul %191, %192, %cst_71 {dimension_numbers = #tpu.dot_dimension_numbers<[1], [0], [0], [1], [0, 0, 1, 1], [], []>} : vector<8x8xbf16>, vector<8x8xbf16>, vector<8x8xf32> -> vector<8x8xf32>
    %194 = arith.truncf %193 : vector<8x8xf32> to vector<8x8xbf16>
    %c3_72 = arith.constant 3 : index
    %c0_73 = arith.constant 0 : index
    %c0_74 = arith.constant 0 : index
    %195 = vector.load %arg8[%c3_72, %c0_73, %c0_74] : memref<4x8x32xbf16, #tpu.memory_space<vmem>>, vector<1x8x32xbf16>
    %196 = vector.shape_cast %195 : vector<1x8x32xbf16> to vector<8x32xbf16>
    %cst_75 = arith.constant dense<0.000000e+00> : vector<8x32xf32>
    %197 = tpu.matmul %194, %196, %cst_75 {dimension_numbers = #tpu.dot_dimension_numbers<[1], [0], [0], [1], [0, 0, 1, 1], [], []>} : vector<8x8xbf16>, vector<8x32xbf16>, vector<8x32xf32> -> vector<8x32xf32>
    %198 = arith.addf %177, %197 : vector<8x32xf32>
    %199 = tpu.concatenate %127, %148, %169, %190 in 1 : vector<8x8xf32>, vector<8x8xf32>, vector<8x8xf32>, vector<8x8xf32> -> vector<8x32xf32>
    %200 = tpu.concatenate %110, %199 in 0 : vector<8x32xf32>, vector<8x32xf32> -> vector<16x32xf32>
    %c0_76 = arith.constant 0 : index
    %c0_77 = arith.constant 0 : index
    %201 = vector.load %arg23[%c0_76, %c0_77] : memref<16x32xf32, #tpu.memory_space<vmem>>, vector<16x32xf32>
    tpu.vector_store %arg23[%c0_76, %c0_77], %200 {strides = array<i32>} : memref<16x32xf32, #tpu.memory_space<vmem>>, vector<16x32xf32>,
    %202 = tpu.concatenate %109, %198 in 0 : vector<8x32xf32>, vector<8x32xf32> -> vector<16x32xf32>
    %c0_78 = arith.constant 0 : index
    %c0_79 = arith.constant 0 : index
    %203 = vector.load %arg9[%c0_78, %c0_79] : memref<1x32xf32, #tpu.memory_space<vmem>>, vector<1x32xf32>
    %204 = vector.broadcast %203 : vector<1x32xf32> to vector<16x32xf32>
    %205 = arith.addf %202, %204 : vector<16x32xf32>
    %206 = arith.addf %205, %7 : vector<16x32xf32>
    %c0_80 = arith.constant 0 : index
    %c0_81 = arith.constant 0 : index
    %207 = vector.load %arg10[%c0_80, %c0_81] : memref<1x32xf32, #tpu.memory_space<vmem>>, vector<1x32xf32>
    %c0_82 = arith.constant 0 : index
    %c0_83 = arith.constant 0 : index
    %208 = vector.load %arg11[%c0_82, %c0_83] : memref<1x32xf32, #tpu.memory_space<vmem>>, vector<1x32xf32>
    %cst_84 = arith.constant dense<0.000000e+00> : vector<16xf32>
    %209 = vector.multi_reduction <add>, %206, %cst_84 [1] : vector<16x32xf32> to vector<16xf32>
    %210 = vector.shape_cast %209 : vector<16xf32> to vector<16x1xf32>
    %cst_85 = arith.constant 3.200000e+01 : f32
    %211 = vector.broadcast %cst_85 : f32 to vector<16x1xf32>
    %212 = arith.divf %210, %211 : vector<16x1xf32>
    %213 = vector.broadcast %212 : vector<16x1xf32> to vector<16x32xf32>
    %214 = arith.subf %206, %213 : vector<16x32xf32>
    %215 = arith.mulf %214, %214 : vector<16x32xf32>
    %cst_86 = arith.constant dense<0.000000e+00> : vector<16xf32>
    %216 = vector.multi_reduction <add>, %215, %cst_86 [1] : vector<16x32xf32> to vector<16xf32>
    %217 = vector.shape_cast %216 : vector<16xf32> to vector<16x1xf32>
    %cst_87 = arith.constant 3.200000e+01 : f32
    %218 = vector.broadcast %cst_87 : f32 to vector<16x1xf32>
    %219 = arith.divf %217, %218 : vector<16x1xf32>
    %220 = vector.broadcast %212 : vector<16x1xf32> to vector<16x32xf32>
    %221 = arith.subf %206, %220 : vector<16x32xf32>
    %cst_88 = arith.constant 9.99999974E-6 : f32
    %222 = vector.broadcast %cst_88 : f32 to vector<16x1xf32>
    %223 = arith.addf %219, %222 : vector<16x1xf32>
    %224 = math.rsqrt %223 : vector<16x1xf32>
    %225 = vector.broadcast %224 : vector<16x1xf32> to vector<16x32xf32>
    %226 = arith.mulf %221, %225 : vector<16x32xf32>
    %227 = vector.broadcast %207 : vector<1x32xf32> to vector<16x32xf32>
    %228 = arith.mulf %226, %227 : vector<16x32xf32>
    %229 = vector.broadcast %208 : vector<1x32xf32> to vector<16x32xf32>
    %230 = arith.addf %228, %229 : vector<16x32xf32>
    %231 = arith.truncf %230 : vector<16x32xf32> to vector<16x32xbf16>
    %c0_89 = arith.constant 0 : index
    %c0_90 = arith.constant 0 : index
    %232 = vector.load %arg12[%c0_89, %c0_90] : memref<32x128xbf16, #tpu.memory_space<vmem>>, vector<32x128xbf16>
    %cst_91 = arith.constant dense<0.000000e+00> : vector<16x128xf32>
    %233 = tpu.matmul %231, %232, %cst_91 {dimension_numbers = #tpu.dot_dimension_numbers<[1], [0], [0], [1], [0, 0, 1, 1], [], []>} : vector<16x32xbf16>, vector<32x128xbf16>, vector<16x128xf32> -> vector<16x128xf32>
    %c0_92 = arith.constant 0 : index
    %c0_93 = arith.constant 0 : index
    %234 = vector.load %arg13[%c0_92, %c0_93] : memref<1x128xf32, #tpu.memory_space<vmem>>, vector<1x128xf32>
    %235 = vector.broadcast %234 : vector<1x128xf32> to vector<16x128xf32>
    %236 = arith.addf %233, %235 : vector<16x128xf32>
    %cst_94 = arith.constant 5.000000e-01 : f32
    %237 = vector.broadcast %cst_94 : f32 to vector<16x128xf32>
    %238 = arith.mulf %237, %236 : vector<16x128xf32>
    %cst_95 = arith.constant 1.41421354 : f32
    %239 = vector.broadcast %cst_95 : f32 to vector<16x128xf32>
    %240 = arith.divf %236, %239 : vector<16x128xf32>
    %241 = math.erf %240 : vector<16x128xf32>
    %cst_96 = arith.constant 1.000000e+00 : f32
    %242 = vector.broadcast %cst_96 : f32 to vector<16x128xf32>
    %243 = arith.addf %242, %241 : vector<16x128xf32>
    %244 = arith.mulf %238, %243 : vector<16x128xf32>
    %245 = arith.truncf %244 : vector<16x128xf32> to vector<16x128xbf16>
    %c0_97 = arith.constant 0 : index
    %c0_98 = arith.constant 0 : index
    %246 = vector.load %arg14[%c0_97, %c0_98] : memref<128x32xbf16, #tpu.memory_space<vmem>>, vector<128x32xbf16>
    %cst_99 = arith.constant dense<0.000000e+00> : vector<16x32xf32>
    %247 = tpu.matmul %245, %246, %cst_99 {dimension_numbers = #tpu.dot_dimension_numbers<[1], [0], [0], [1], [0, 0, 1, 1], [], []>} : vector<16x128xbf16>, vector<128x32xbf16>, vector<16x32xf32> -> vector<16x32xf32>
    %c0_100 = arith.constant 0 : index
    %c0_101 = arith.constant 0 : index
    %248 = vector.load %arg15[%c0_100, %c0_101] : memref<1x32xf32, #tpu.memory_space<vmem>>, vector<1x32xf32>
    %249 = vector.broadcast %248 : vector<1x32xf32> to vector<16x32xf32>
    %250 = arith.addf %247, %249 : vector<16x32xf32>
    %251 = arith.addf %250, %230 : vector<16x32xf32>
    %c0_102 = arith.constant 0 : index
    %c0_103 = arith.constant 0 : index
    %252 = vector.load %arg16[%c0_102, %c0_103] : memref<1x32xf32, #tpu.memory_space<vmem>>, vector<1x32xf32>
    %c0_104 = arith.constant 0 : index
    %c0_105 = arith.constant 0 : index
    %253 = vector.load %arg17[%c0_104, %c0_105] : memref<1x32xf32, #tpu.memory_space<vmem>>, vector<1x32xf32>
    %cst_106 = arith.constant dense<0.000000e+00> : vector<16xf32>
    %254 = vector.multi_reduction <add>, %251, %cst_106 [1] : vector<16x32xf32> to vector<16xf32>
    %255 = vector.shape_cast %254 : vector<16xf32> to vector<16x1xf32>
    %cst_107 = arith.constant 3.200000e+01 : f32
    %256 = vector.broadcast %cst_107 : f32 to vector<16x1xf32>
    %257 = arith.divf %255, %256 : vector<16x1xf32>
    %258 = vector.broadcast %257 : vector<16x1xf32> to vector<16x32xf32>
    %259 = arith.subf %251, %258 : vector<16x32xf32>
    %260 = arith.mulf %259, %259 : vector<16x32xf32>
    %cst_108 = arith.constant dense<0.000000e+00> : vector<16xf32>
    %261 = vector.multi_reduction <add>, %260, %cst_108 [1] : vector<16x32xf32> to vector<16xf32>
    %262 = vector.shape_cast %261 : vector<16xf32> to vector<16x1xf32>
    %cst_109 = arith.constant 3.200000e+01 : f32
    %263 = vector.broadcast %cst_109 : f32 to vector<16x1xf32>
    %264 = arith.divf %262, %263 : vector<16x1xf32>
    %265 = vector.broadcast %257 : vector<16x1xf32> to vector<16x32xf32>
    %266 = arith.subf %251, %265 : vector<16x32xf32>
    %cst_110 = arith.constant 9.99999974E-6 : f32
    %267 = vector.broadcast %cst_110 : f32 to vector<16x1xf32>
    %268 = arith.addf %264, %267 : vector<16x1xf32>
    %269 = math.rsqrt %268 : vector<16x1xf32>
    %270 = vector.broadcast %269 : vector<16x1xf32> to vector<16x32xf32>
    %271 = arith.mulf %266, %270 : vector<16x32xf32>
    %272 = vector.broadcast %252 : vector<1x32xf32> to vector<16x32xf32>
    %273 = arith.mulf %271, %272 : vector<16x32xf32>
    %274 = vector.broadcast %253 : vector<1x32xf32> to vector<16x32xf32>
    %275 = arith.addf %273, %274 : vector<16x32xf32>
    %c0_111 = arith.constant 0 : index
    %c0_112 = arith.constant 0 : index
    %276 = vector.load %arg3[%c0_111, %c0_112] : memref<2x16xf32, #tpu.memory_space<vmem>>, vector<2x16xf32>
    %cst_113 = arith.constant dense<0.000000e+00> : vector<2x32xf32>
    %277 = tpu.matmul %276, %275, %cst_113 {dimension_numbers = #tpu.dot_dimension_numbers<[1], [0], [0], [1], [0, 0, 1, 1], [], []>} : vector<2x16xf32>, vector<16x32xf32>, vector<2x32xf32> -> vector<2x32xf32>
    %278 = arith.truncf %277 : vector<2x32xf32> to vector<2x32xbf16>
    %c0_114 = arith.constant 0 : index
    %c0_115 = arith.constant 0 : index
    %279 = vector.load %arg18[%c0_114, %c0_115] : memref<32x16xbf16, #tpu.memory_space<vmem>>, vector<32x16xbf16>
    %cst_116 = arith.constant dense<0.000000e+00> : vector<2x16xf32>
    %280 = tpu.matmul %278, %279, %cst_116 {dimension_numbers = #tpu.dot_dimension_numbers<[1], [0], [0], [1], [0, 0, 1, 1], [], []>} : vector<2x32xbf16>, vector<32x16xbf16>, vector<2x16xf32> -> vector<2x16xf32>
    %c0_117 = arith.constant 0 : index
    %c0_118 = arith.constant 0 : index
    %281 = vector.load %arg19[%c0_117, %c0_118] : memref<1x16xf32, #tpu.memory_space<vmem>>, vector<1x16xf32>
    %282 = vector.broadcast %281 : vector<1x16xf32> to vector<2x16xf32>
    %283 = arith.addf %280, %282 : vector<2x16xf32>
    %cst_119 = arith.constant 5.000000e-01 : f32
    %284 = vector.broadcast %cst_119 : f32 to vector<2x16xf32>
    %285 = arith.mulf %284, %283 : vector<2x16xf32>
    %cst_120 = arith.constant 1.41421354 : f32
    %286 = vector.broadcast %cst_120 : f32 to vector<2x16xf32>
    %287 = arith.divf %283, %286 : vector<2x16xf32>
    %288 = math.erf %287 : vector<2x16xf32>
    %cst_121 = arith.constant 1.000000e+00 : f32
    %289 = vector.broadcast %cst_121 : f32 to vector<2x16xf32>
    %290 = arith.addf %289, %288 : vector<2x16xf32>
    %291 = arith.mulf %285, %290 : vector<2x16xf32>
    %292 = arith.truncf %291 : vector<2x16xf32> to vector<2x16xbf16>
    %c0_122 = arith.constant 0 : index
    %c0_123 = arith.constant 0 : index
    %293 = vector.load %arg20[%c0_122, %c0_123] : memref<16x1xbf16, #tpu.memory_space<vmem>>, vector<16x1xbf16>
    %cst_124 = arith.constant dense<0.000000e+00> : vector<2x1xf32>
    %294 = tpu.matmul %292, %293, %cst_124 {dimension_numbers = #tpu.dot_dimension_numbers<[1], [0], [0], [1], [0, 0, 1, 1], [], []>} : vector<2x16xbf16>, vector<16x1xbf16>, vector<2x1xf32> -> vector<2x1xf32>
    %c0_125 = arith.constant 0 : index
    %c0_126 = arith.constant 0 : index
    %295 = vector.load %arg21[%c0_125, %c0_126] : memref<1x1xf32, #tpu.memory_space<vmem>>, vector<1x1xf32>
    %296 = vector.broadcast %295 : vector<1x1xf32> to vector<2x1xf32>
    %297 = arith.addf %294, %296 : vector<2x1xf32>
    %298 = arith.negf %297 : vector<2x1xf32>
    %299 = math.exp %298 : vector<2x1xf32>
    %cst_127 = arith.constant 1.000000e+00 : f32
    %300 = vector.broadcast %cst_127 : f32 to vector<2x1xf32>
    %301 = arith.addf %300, %299 : vector<2x1xf32>
    %302 = arith.divf %300, %301 : vector<2x1xf32>
    %c0_128 = arith.constant 0 : index
    %c0_129 = arith.constant 0 : index
    %303 = vector.load %arg22[%c0_128, %c0_129] : memref<2x1xf32, #tpu.memory_space<vmem>>, vector<2x1xf32>
    tpu.vector_store %arg22[%c0_128, %c0_129], %302 {strides = array<i32>} : memref<2x1xf32, #tpu.memory_space<vmem>>, vector<2x1xf32>,
    return
  }
  func.func @transform_0(%arg0: i32) -> (i32, i32) {
    %c0_i32 = arith.constant 0 : i32
    %c0_i32_0 = arith.constant 0 : i32
    %c0_i32_1 = arith.constant 0 : i32
    return %c0_i32, %c0_i32_0 : i32, i32
  }
  func.func @transform_1(%arg0: i32) -> (i32, i32) {
    %c0_i32 = arith.constant 0 : i32
    %c0_i32_0 = arith.constant 0 : i32
    %c0_i32_1 = arith.constant 0 : i32
    return %c0_i32, %c0_i32_0 : i32, i32
  }
  func.func @transform_2(%arg0: i32) -> (i32, i32) {
    %c0_i32 = arith.constant 0 : i32
    %c0_i32_0 = arith.constant 0 : i32
    %c0_i32_1 = arith.constant 0 : i32
    return %c0_i32, %c0_i32_0 : i32, i32
  }
  func.func @transform_3(%arg0: i32) -> (i32, i32) {
    %c0_i32 = arith.constant 0 : i32
    %c0_i32_0 = arith.constant 0 : i32
    %c0_i32_1 = arith.constant 0 : i32
    return %c0_i32, %c0_i32_0 : i32, i32
  }
  func.func @transform_4(%arg0: i32) -> (i32, i32) {
    %c0_i32 = arith.constant 0 : i32
    %c0_i32_0 = arith.constant 0 : i32
    %c0_i32_1 = arith.constant 0 : i32
    return %c0_i32, %c0_i32_0 : i32, i32
  }
  func.func @transform_5(%arg0: i32) -> (i32, i32) {
    %c0_i32 = arith.constant 0 : i32
    %c0_i32_0 = arith.constant 0 : i32
    %c0_i32_1 = arith.constant 0 : i32
    return %c0_i32, %c0_i32_0 : i32, i32
  }
  func.func @transform_6(%arg0: i32) -> (i32, i32) {
    %c0_i32 = arith.constant 0 : i32
    %c0_i32_0 = arith.constant 0 : i32
    %c0_i32_1 = arith.constant 0 : i32
    return %c0_i32, %c0_i32_0 : i32, i32
  }
  func.func @transform_7(%arg0: i32) -> (i32, i32, i32) {
    %c0_i32 = arith.constant 0 : i32
    %c0_i32_0 = arith.constant 0 : i32
    %c0_i32_1 = arith.constant 0 : i32
    %c0_i32_2 = arith.constant 0 : i32
    return %c0_i32, %c0_i32_0, %c0_i32_1 : i32, i32, i32
  }
  func.func @transform_8(%arg0: i32) -> (i32, i32) {
    %c0_i32 = arith.constant 0 : i32
    %c0_i32_0 = arith.constant 0 : i32
    %c0_i32_1 = arith.constant 0 : i32
    return %c0_i32, %c0_i32_0 : i32, i32
  }
  func.func @transform_9(%arg0: i32) -> (i32, i32) {
    %c0_i32 = arith.constant 0 : i32
    %c0_i32_0 = arith.constant 0 : i32
    %c0_i32_1 = arith.constant 0 : i32
    return %c0_i32, %c0_i32_0 : i32, i32
  }
  func.func @transform_10(%arg0: i32) -> (i32, i32) {
    %c0_i32 = arith.constant 0 : i32
    %c0_i32_0 = arith.constant 0 : i32
    %c0_i32_1 = arith.constant 0 : i32
    return %c0_i32, %c0_i32_0 : i32, i32
  }
  func.func @transform_11(%arg0: i32) -> (i32, i32) {
    %c0_i32 = arith.constant 0 : i32
    %c0_i32_0 = arith.constant 0 : i32
    %c0_i32_1 = arith.constant 0 : i32
    return %c0_i32, %c0_i32_0 : i32, i32
  }
  func.func @transform_12(%arg0: i32) -> (i32, i32) {
    %c0_i32 = arith.constant 0 : i32
    %c0_i32_0 = arith.constant 0 : i32
    %c0_i32_1 = arith.constant 0 : i32
    return %c0_i32, %c0_i32_0 : i32, i32
  }
  func.func @transform_13(%arg0: i32) -> (i32, i32) {
    %c0_i32 = arith.constant 0 : i32
    %c0_i32_0 = arith.constant 0 : i32
    %c0_i32_1 = arith.constant 0 : i32
    return %c0_i32, %c0_i32_0 : i32, i32
  }
  func.func @transform_14(%arg0: i32) -> (i32, i32) {
    %c0_i32 = arith.constant 0 : i32
    %c0_i32_0 = arith.constant 0 : i32
    %c0_i32_1 = arith.constant 0 : i32
    return %c0_i32, %c0_i32_0 : i32, i32
  }
  func.func @transform_15(%arg0: i32) -> (i32, i32) {
    %c0_i32 = arith.constant 0 : i32
    %c0_i32_0 = arith.constant 0 : i32
    %c0_i32_1 = arith.constant 0 : i32
    return %c0_i32, %c0_i32_0 : i32, i32
  }
  func.func @transform_16(%arg0: i32) -> (i32, i32) {
    %c0_i32 = arith.constant 0 : i32
    %c0_i32_0 = arith.constant 0 : i32
    %c0_i32_1 = arith.constant 0 : i32
    return %c0_i32, %c0_i32_0 : i32, i32
  }
  func.func @transform_17(%arg0: i32) -> (i32, i32) {
    %c0_i32 = arith.constant 0 : i32
    %c0_i32_0 = arith.constant 0 : i32
    %c0_i32_1 = arith.constant 0 : i32
    return %c0_i32, %c0_i32_0 : i32, i32
  }
  func.func @transform_18(%arg0: i32) -> (i32, i32) {
    %c0_i32 = arith.constant 0 : i32
    %c0_i32_0 = arith.constant 0 : i32
    %c0_i32_1 = arith.constant 0 : i32
    return %c0_i32, %c0_i32_0 : i32, i32
  }
  func.func @transform_19(%arg0: i32) -> (i32, i32) {
    %c0_i32 = arith.constant 0 : i32
    %c0_i32_0 = arith.constant 0 : i32
    %c0_i32_1 = arith.constant 0 : i32
    return %c0_i32, %c0_i32_0 : i32, i32
  }
  func.func @transform_20(%arg0: i32) -> (i32, i32) {
    %c0_i32 = arith.constant 0 : i32
    %c0_i32_0 = arith.constant 0 : i32
    %c0_i32_1 = arith.constant 0 : i32
    return %c0_i32, %c0_i32_0 : i32, i32
  }
  func.func @transform_21(%arg0: i32) -> (i32, i32) {
    %c0_i32 = arith.constant 0 : i32
    %c0_i32_0 = arith.constant 0 : i32
    %c0_i32_1 = arith.constant 0 : i32
    return %c0_i32, %c0_i32_0 : i32, i32
  }
  func.func @transform_22(%arg0: i32) -> (i32, i32) {
    %c0_i32 = arith.constant 0 : i32
    %c0_i32_0 = arith.constant 0 : i32
    %c0_i32_1 = arith.constant 0 : i32
    return %c0_i32, %c0_i32_0 : i32, i32
  }
}

</mosaic_0001>

<bundles_post_ra>
// kernel: tpu_custom_call.1
= control target key start
LH: loop header
LB: loop body
LE: loop exit
PB: predicated region body
PF: predicated region fallthrough
CT: control target
= control target key end

     0   :  { %s3063_s0 = inlined_call_operand.vmem [shape: bf16[16,16], index: 0, kind: input, shape index: {}]   ;;  %s3064_s1 = inlined_call_operand.vmem [shape: f32[16,32], index: 1, kind: input, shape index: {}]   ;;  %s3065_s2 = inlined_call_operand.vmem [shape: f32[2,16], index: 2, kind: input, shape index: {}]   ;;  %s3066_s3 = inlined_call_operand.vmem [shape: bf16[16,32], index: 3, kind: input, shape index: {}]   ;;  %s3067_s4 = inlined_call_operand.vmem [shape: f32[1,32], index: 4, kind: input, shape index: {}]   ;;  %s3068_s5 = inlined_call_operand.vmem [shape: bf16[32,96], index: 5, kind: input, shape index: {}]   ;;  %s3069_s6 = inlined_call_operand.vmem [shape: f32[1,96], index: 6, kind: input, shape index: {}]   ;;  %s3070_s7 = inlined_call_operand.vmem [shape: bf16[4,8,32], index: 7, kind: input, shape index: {}]   ;;  %s3071_s8 = inlined_call_operand.vmem [shape: f32[1,32], index: 8, kind: input, shape index: {}]   ;;  %s3072_s9 = inlined_call_operand.vmem [shape: f32[1,32], index: 9, kind: input, shape index: {}]   ;;  %s3073_s10 = inlined_call_operand.vmem [shape: f32[1,32], index: 10, kind: input, shape index: {}]   ;;  %s3074_s11 = inlined_call_operand.vmem [shape: bf16[32,128], index: 11, kind: input, shape index: {}]   ;;  %s3075_s12 = inlined_call_operand.vmem [shape: f32[1,128], index: 12, kind: input, shape index: {}]   ;;  %s3076_s13 = inlined_call_operand.vmem [shape: bf16[128,32], index: 13, kind: input, shape index: {}]   ;;  %s3077_s14 = inlined_call_operand.vmem [shape: f32[1,32], index: 14, kind: input, shape index: {}]   ;;  %s3078_s15 = inlined_call_operand.vmem [shape: f32[1,32], index: 15, kind: input, shape index: {}]   ;;  %s3079_s16 = inlined_call_operand.vmem [shape: f32[1,32], index: 16, kind: input, shape index: {}]   ;;  %s3080_s17 = inlined_call_operand.vmem [shape: bf16[32,16], index: 17, kind: input, shape index: {}]   ;;  %s3081_s18 = inlined_call_operand.vmem [shape: f32[1,16], index: 18, kind: input, shape index: {}]   ;;  %s3082_s19 = inlined_call_operand.vmem [shape: bf16[16,1], index: 19, kind: input, shape index: {}]   ;;  %s3083_s20 = inlined_call_operand.<no memory space> [shape: f32[1,1], index: 20, kind: input, shape index: {}]   ;;  %s3084_s21 = inlined_call_operand.vmem [shape: f32[2,1], index: 21, kind: output, shape index: {0}]   ;;  %s3085_s22 = inlined_call_operand.hbm [shape: f32[16,32], index: 22, kind: output, shape index: {1}]  }
   0x1   :  { %3088 = sst [smem:[#allocation6_spill]] %s3063_s0  ;;  %v28_v0 = vstv %s3083_s20 }
   0x2   :  { %3089 = sst [smem:[#allocation7_spill]] %s3064_s1  ;;  %29 = vst [vmem:[#allocation2] sm:$0x1] %v28_v0 }
   0x3   :  { %3090 = sst [smem:[#allocation8_spill]] %s3065_s2 }
   0x4   :  { %3091 = sst [smem:[#allocation9_spill]] %s3066_s3 }
   0x5   :  { %3092 = sst [smem:[#allocation10_spill]] %s3067_s4 }
   0x6   :  { %3093 = sst [smem:[#allocation11_spill]] %s3068_s5 }
   0x7   :  { %3094 = sst [smem:[#allocation12_spill]] %s3069_s6 }
   0x8   :  { %s3095_s4 = sld [smem:[#allocation9_spill]]  ;;  %v2490_v2 = vmov 0.0   ;;  %s3096_s1 = sld [smem:[#allocation6_spill]]  ;;  %vm2491_vm0 = vmmov 0   ;;  %vm96_vm1 = vcmask 130048  }
   0x9   :  { %2170 = vmatprep.subr.bf16.mxu0 %v2490_v2  ;;  %2176 = vmatprep.subr.bf16.mxu1 %v2490_v2 }
   0xa   :  { %2172 = vmatprep.mubr.msk.bf16.mxu0 %vm2491_vm0, %v2490_v2  ;;  %2180 = vmatprep.mubr.msk.bf16.mxu1 %vm2491_vm0, %v2490_v2 }
   0xe   :  { %v2399_v1 = vld [vmem:[%s3095_s4] sm:$0xff]  }
   0xf   :  { %v2400_v3 = vld [vmem:[%s3096_s1] sm:$0xff]   ;;  %2171 = vmatpush3.bf16.msra.mxu0 %v2399_v1 }
  0x10   :  { %2184 = vmatprep.subr.bf16.mxu0 %v2490_v2 }
  0x12   :  { %2173 = vmatmul.mubr.msk.bf16.vlgmr.msra.gmra.mrb[0].mxu0 %vm96_vm1, %v2400_v3 }
  0x13   :  { %2186 = vmatprep.mubr.msk.bf16.mxu0 %vm2491_vm0, %v2490_v2 }
  0x14   :  { %30 = vsyncpa [#allocation4], 0  ;;  %s3097_s24 = sld [smem:[#allocation11_spill]]  ;;  %s3098_s27 = sld [smem:[#allocation10_spill]]  ;;  %vm169_vm2 = vcmask 261120   ;;  %vm221_vm3 = vcmask 64512  }
  0x15   :  { %s3099_s29 = sld [smem:[#allocation7_spill]]  ;;  %s3100_s1 = sld [smem:[#allocation12_spill]]  ;;  %vm285_vm4 = vcmask 1043456   ;;  %v330_v3 = vld [vmem:[%s3070_s7] sm:$0xf]  ;;  %vm871_vm5 = vcmask 195584  }
  0x16   :  { %s2492_s20 = smov 96   ;;  %s2493_s5 = smov 120  }
  0x17   :  { %s2495_s6 = smov 64   ;;  %s2496_s25 = smov 56  }
  0x18   :  { %s2497_s26 = smov 112   ;;  %s2498_s2 = smov 80  }
  0x19   :  { %s2499_s30 = smov 72   ;;  %s2500_s4 = smov 104  }
  0x1a   :  { %v2401_v4 = vld [vmem:[%s3097_s24] sm:$0xff]   ;;  %v2402_v5 = vld [vmem:[%s3097_s24 + $0x8] sm:$0xff]   ;;  %s2494_s24 = smov 88   ;;  %s2501_s0 = smov 48  }
  0x1b   :  { %2177 = vmatpush3.bf16.msra.mxu1 %v2401_v4  ;;  %v2035_v6 = vld [vmem:[%s3098_s27] ss:$0 sm:$0xff]  ;;  %v142_v12 = vld [vmem:[%s3099_s29 + $0x8] sm:$0xff]  ;;  %v2727_v4 = vsel %vm285_vm4, %v330_v3, 0  ;;  %s2502_s27 = smov 40   ;;  %s2504_s3 = smov 16  }
  0x1c   :  { %2178 = vmatprep.subr.bf16.mxu1 %v2490_v2  ;;  %v141_v10 = vld [vmem:[%s3099_s29] sm:$0xff]  ;;  %s2505_s28 = smov 24   ;;  %s3101_s23 = sld [smem:[#allocation8_spill]] }
  0x1d   :  { %v2039_v18 = vld [vmem:[%s3100_s1] ss:$0 sm:$0xff] }
  0x1f   :  { %2179 = vmatpush3.bf16.msra.mxu1 %v2402_v5  ;;  %v2047_v5 = vld [vmem:[%s3070_s7 + $0x4] sm:$0xf] }
  0x20   :  { %2190 = vmatprep.subr.bf16.mxu1 %v2490_v2 }
  0xe5   :  { %v134_v7 = vpop.f32.mrb[0].mxu0 }
  0xe6   :  { %v135_v8 = vadd.f32 %v2035_v6, %v134_v7  ;;  %v2174_v9 = vpop.f32.mrb[1].mxu0 }
  0xe7   :  { %v137_v11 = vpop.f32.mrb[2].mxu0 }
  0xe8   :  { %v138_v13 = vadd.f32 %v2035_v6, %v137_v11  ;;  %v2175_v14 = vpop.f32.mrb[3].mxu0  ;;  %v2660_v15 = vadd.f32 %v141_v10, %v135_v8  ;;  %v2734_v6 = vsel %vm285_vm4, %v2047_v5, 0 }
  0xea   :  { %v2662_v16 = vadd.f32 %v142_v12, %v138_v13 }
  0xec   :  { %v145_v17 = vpack.c.bf16 %v2662_v16, %v2660_v15 }
  0xee   :  { %2181 = vmatmul.mubr.msk.bf16.vlgmr.msra.gmra.mrb[0].mxu1 %vm169_vm2, %v145_v17 }
  0xef   :  { %2192 = vmatprep.mubr.msk.bf16.mxu1 %vm2491_vm0, %v2490_v2 }
 0x1c1   :  { %v207_v19 = vpop.f32.mrb[0].mxu1 }
 0x1c2   :  { %v208_v20 = vadd.f32 %v2039_v18, %v207_v19  ;;  %v2182_v21 = vpop.f32.mrb[1].mxu1 }
 0x1c3   :  { %v210_v22 = vpop.f32.mrb[2].mxu1 }
 0x1c4   :  { %v211_v23 = vadd.f32 %v2039_v18, %v210_v22  ;;  %v2183_v24 = vpop.f32.mrb[3].mxu1  ;;  %v214_v25 = vmul.f32 0.35355338, %v208_v20 }
 0x1c6   :  { %v215_v26 = vmul.f32 0.35355338, %v211_v23  ;;  %v2672_v27 = vpack.c.bf16 %v211_v23, %v208_v20 }
 0x1c8   :  { %v2674_v28 = vpack.c.bf16 %v215_v26, %v214_v25  ;;  %219 = vrot.lane.b32.xlu0 %v2672_v27, %s2492_s20  ;;  %v2789_v3 = vrot.slane %v2672_v27, 4 }
 0x1ca   :  { %332 = vrot.lane.b32.xlu1 %v2674_v28, %s2493_s5 }
 0x1cc   :  { %334 = vrot.lane.b32.xlu0 %v2672_v27, %s2494_s24 }
 0x23a   :  { %v220_v29 = vpop.permute.xlu0 %219 }
 0x23b   :  { %v226_v30 = vsel %vm221_vm3, %v220_v29, 0 }
 0x23c   :  { %2185 = vmatpush3.bf16.xpose.msra.mxu0 %v226_v30  ;;  %v333_v33 = vpop.permute.xlu1 %332 }
 0x23d   :  { %2196 = vmatprep.subr.bf16.mxu0 %v2490_v2 }
 0x23e   :  { %v335_v31 = vpop.permute.xlu0 %334 }
 0x23f   :  { %v340_v32 = vsel %vm221_vm3, %v335_v31, 0 }
 0x243   :  { %2187 = vmatmul.mubr.msk.bf16.vlgmr.msra.gmra.mrb[4].mxu0 %vm221_vm3, %v2674_v28 }
 0x244   :  { %2197 = vmatpush3.bf16.xpose.msra.mxu0 %v340_v32  ;;  %2198 = vmatprep.mubr.msk.bf16.mxu0 %vm2491_vm0, %v2490_v2 }
 0x245   :  { %2208 = vmatprep.subr.bf16.mxu0 %v2490_v2 }
 0x24b   :  { %2199 = vmatmul.mubr.msk.bf16.vlgmr.msra.gmra.mrb[8].mxu0 %vm221_vm3, %v333_v33 }
 0x24c   :  { %2210 = vmatprep.mubr.msk.bf16.mxu0 %vm2491_vm0, %v2490_v2  ;;  %2209 = vmatpush3.bf16.msra.mxu0 %v2734_v6 }
 0x24d   :  { %2220 = vmatprep.subr.bf16.mxu0 %v2490_v2 }
 0x316   :  { %v262_v34 = vpop.f32.mrb[4].mxu0 }
 0x317   :  { %v2188_v35 = vpop.f32.mrb[5].mxu0  ;;  %v268_v36 = vsel %vm221_vm3, %v262_v34, -inf }
 0x318   :  { %269 = vmax.xlane.f32.xlu1 %v268_v36  ;;  %v265_v37 = vpop.f32.mrb[6].mxu0 }
 0x319   :  { %v2189_v38 = vpop.f32.mrb[7].mxu0 }
 0x31e   :  { %v376_v39 = vpop.f32.mrb[8].mxu0 }
 0x31f   :  { %v2200_v40 = vpop.f32.mrb[9].mxu0  ;;  %v382_v41 = vsel %vm221_vm3, %v376_v39, -inf }
 0x320   :  { %383 = vmax.xlane.f32.xlu0 %v382_v41  ;;  %v379_v42 = vpop.f32.mrb[10].mxu0 }
 0x321   :  { %v2201_v43 = vpop.f32.mrb[11].mxu0 }
 0x3a5   :  { %v270_v44 = vpop.xlane.xlu1 %269 }
 0x3a6   :  { %v271_v45 = vsub.f32 %v262_v34, %v270_v44 }
 0x3a8   :  { %v272_v46 = vmul.f32 1.442695, %v271_v45 }
 0x3aa   :  { %2416 = vpow2.f32 %v272_v46 }
 0x3ad   :  { %v384_v47 = vpop.xlane.xlu0 %383 }
 0x3ae   :  { %v385_v48 = vsub.f32 %v376_v39, %v384_v47 }
 0x3b0   :  { %v386_v49 = vmul.f32 1.442695, %v385_v48 }
 0x3b2   :  { %2418 = vpow2.f32 %v386_v49 }
 0x3b4   :  { %v2417_v50 = vpop.eup %2416 }
 0x3b5   :  { %v274_v51 = vsel %vm221_vm3, %v2417_v50, 0.0 }
 0x3b6   :  { %275 = vadd.xlane.f32.xlu0 %v274_v51 }
 0x3bc   :  { %v2419_v52 = vpop.eup %2418 }
 0x3bd   :  { %v388_v53 = vsel %vm221_vm3, %v2419_v52, 0.0 }
 0x3be   :  { %389 = vadd.xlane.f32.xlu1 %v388_v53 }
 0x3cc   :  { %280 = vrot.lane.b32.xlu0 %v2672_v27, %s2495_s6 }
 0x3cf   :  { %394 = vrot.lane.b32.xlu1 %v2672_v27, %s2496_s25 }
 0x3d0   :  { %537 = vrot.lane.b32.xlu0 %v2674_v28, %s2497_s26 }
 0x3d3   :  { %539 = vrot.lane.b32.xlu1 %v2672_v27, %s2498_s2 }
 0x443   :  { %v276_v54 = vpop.xlane.xlu0 %275 }
 0x444   :  { %2420 = vrcp.f32 %v276_v54 }
 0x447   :  { %v281_v55 = vpop.permute.xlu0 %280 }
 0x448   :  { %v287_v56 = vsel %vm285_vm4, %v281_v55, 0 }
 0x449   :  { %2191 = vmatpush3.bf16.msra.mxu1 %v287_v56 }
 0x44a   :  { %2202 = vmatprep.subr.bf16.mxu1 %v2490_v2 }
 0x44b   :  { %v390_v57 = vpop.xlane.xlu1 %389  ;;  %v538_v21 = vpop.permute.xlu0 %537 }
 0x44c   :  { %2422 = vrcp.f32 %v390_v57 }
 0x44e   :  { %v2421_v58 = vpop.eup %2420 }
 0x44f   :  { %v2707_v59 = vmul.f32 %v2421_v58, %v2417_v50  ;;  %v395_v60 = vpop.permute.xlu1 %394 }
 0x450   :  { %v400_v62 = vsel %vm285_vm4, %v395_v60, 0 }
 0x451   :  { %v279_v61 = vpack.c.bf16 %v2707_v59, %v2707_v59 }
 0x453   :  { %2193 = vmatmul.mubr.msk.bf16.vlgmr.msra.gmra.mrb[4].mxu1 %vm221_vm3, %v279_v61  ;;  %v540_v12 = vpop.permute.xlu1 %539 }
 0x454   :  { %2203 = vmatpush3.bf16.msra.mxu1 %v400_v62  ;;  %2204 = vmatprep.mubr.msk.bf16.mxu1 %vm2491_vm0, %v2490_v2  ;;  %v545_v19 = vsel %vm221_vm3, %v540_v12, 0 }
 0x455   :  { %2214 = vmatprep.subr.bf16.mxu1 %v2490_v2 }
 0x456   :  { %v2423_v63 = vpop.eup %2422 }
 0x457   :  { %v2716_v0 = vmul.f32 %v2423_v63, %v2419_v52  ;;  %v2052_v52 = vld [vmem:[%s3070_s7 + $0x8] sm:$0xf] }
 0x458   :  { %v2778_v53 = vsel %vm285_vm4, %v2052_v52, 0 }
 0x459   :  { %v393_v1 = vpack.c.bf16 %v2716_v0, %v2716_v0 }
 0x45b   :  { %2205 = vmatmul.mubr.msk.bf16.vlgmr.msra.gmra.mrb[8].mxu1 %vm221_vm3, %v393_v1 }
 0x45c   :  { %2216 = vmatprep.mubr.msk.bf16.mxu1 %vm2491_vm0, %v2490_v2  ;;  %2215 = vmatpush3.bf16.msra.mxu1 %v2727_v4 }
 0x45d   :  { %2226 = vmatprep.subr.bf16.mxu1 %v2490_v2 }
 0x526   :  { %v323_v7 = vpop.f32.mrb[4].mxu1 }
 0x527   :  { %v329_v8 = vpack.c.bf16 %v323_v7, %v323_v7  ;;  %v2194_v9 = vpop.f32.mrb[5].mxu1 }
 0x528   :  { %v326_v10 = vpop.f32.mrb[6].mxu1 }
 0x529   :  { %v2195_v11 = vpop.f32.mrb[7].mxu1  ;;  %2217 = vmatmul.mubr.msk.bf16.vlgmr.msra.gmra.mrb[12].mxu1 %vm221_vm3, %v329_v8 }
 0x52a   :  { %2228 = vmatprep.mubr.msk.bf16.mxu1 %vm2491_vm0, %v2490_v2 }
 0x52e   :  { %v436_v13 = vpop.f32.mrb[8].mxu1 }
 0x52f   :  { %v442_v14 = vpack.c.bf16 %v436_v13, %v436_v13  ;;  %v2206_v17 = vpop.f32.mrb[9].mxu1 }
 0x530   :  { %v439_v18 = vpop.f32.mrb[10].mxu1 }
 0x531   :  { %v2207_v20 = vpop.f32.mrb[11].mxu1  ;;  %2211 = vmatmul.mubr.msk.bf16.vlgmr.msra.gmra.mrb[12].mxu0 %vm221_vm3, %v442_v14 }
 0x532   :  { %2221 = vmatpush3.bf16.xpose.msra.mxu0 %v545_v19  ;;  %2222 = vmatprep.mubr.msk.bf16.mxu0 %vm2491_vm0, %v2490_v2 }
 0x533   :  { %2232 = vmatprep.subr.bf16.mxu0 %v2490_v2 }
 0x539   :  { %2223 = vmatmul.mubr.msk.bf16.vlgmr.msra.gmra.mrb[16].mxu0 %vm221_vm3, %v538_v21 }
 0x53a   :  { %2234 = vmatprep.mubr.msk.bf16.mxu0 %vm2491_vm0, %v2490_v2  ;;  %2233 = vmatpush3.bf16.msra.mxu0 %v2778_v53 }
 0x53b   :  { %2244 = vmatprep.subr.bf16.mxu0 %v2490_v2 }
 0x5fc   :  { %v531_v22 = vpop.f32.mrb[12].mxu1 }
 0x5fd   :  { %v2218_v23 = vpop.f32.mrb[13].mxu1 }
 0x5fe   :  { %v534_v24 = vpop.f32.mrb[14].mxu1 }
 0x5ff   :  { %v2219_v25 = vpop.f32.mrb[15].mxu1 }
 0x604   :  { %v485_v26 = vpop.f32.mrb[12].mxu0 }
 0x605   :  { %v2750_v29 = vadd.f32 %v531_v22, %v485_v26  ;;  %v2212_v30 = vpop.f32.mrb[13].mxu0 }
 0x606   :  { %v488_v31 = vpop.f32.mrb[14].mxu0  ;;  %v2056_v30 = vld [vmem:[%s3070_s7 + $0xc] sm:$0xf] }
 0x607   :  { %v2213_v32 = vpop.f32.mrb[15].mxu0  ;;  %v2830_v31 = vsel %vm285_vm4, %v2056_v30, 0 }
 0x60c   :  { %v581_v33 = vpop.f32.mrb[16].mxu0 }
 0x60d   :  { %v2224_v34 = vpop.f32.mrb[17].mxu0  ;;  %v587_v35 = vsel %vm221_vm3, %v581_v33, -inf }
 0x60e   :  { %588 = vmax.xlane.f32.xlu1 %v587_v35  ;;  %v584_v36 = vpop.f32.mrb[18].mxu0 }
 0x60f   :  { %v2225_v37 = vpop.f32.mrb[19].mxu0 }
 0x61f   :  { %699 = vrot.lane.b32.xlu1 %v2672_v27, %s2499_s30 }
 0x623   :  { %697 = vrot.lane.b32.xlu1 %v2674_v28, %s2500_s4 }
 0x69b   :  { %v589_v38 = vpop.xlane.xlu1 %588 }
 0x69c   :  { %v590_v39 = vsub.f32 %v581_v33, %v589_v38 }
 0x69e   :  { %v591_v40 = vmul.f32 1.442695, %v590_v39 }
 0x69f   :  { %v700_v48 = vpop.permute.xlu1 %699 }
 0x6a0   :  { %2424 = vpow2.f32 %v591_v40  ;;  %v705_v50 = vsel %vm221_vm3, %v700_v48, 0 }
 0x6a3   :  { %v698_v51 = vpop.permute.xlu1 %697 }
 0x6aa   :  { %v2425_v41 = vpop.eup %2424 }
 0x6ab   :  { %v593_v42 = vsel %vm221_vm3, %v2425_v41, 0.0 }
 0x6ac   :  { %594 = vadd.xlane.f32.xlu0 %v593_v42 }
 0x6c2   :  { %599 = vrot.lane.b32.xlu0 %v2672_v27, %s2501_s0 }
 0x739   :  { %v595_v43 = vpop.xlane.xlu0 %594 }
 0x73a   :  { %2426 = vrcp.f32 %v595_v43 }
 0x73d   :  { %v600_v44 = vpop.permute.xlu0 %599 }
 0x73e   :  { %v605_v45 = vsel %vm285_vm4, %v600_v44, 0 }
 0x73f   :  { %2227 = vmatpush3.bf16.msra.mxu1 %v605_v45 }
 0x740   :  { %2238 = vmatprep.subr.bf16.mxu1 %v2490_v2 }
 0x744   :  { %v2427_v46 = vpop.eup %2426 }
 0x745   :  { %v2762_v47 = vmul.f32 %v2427_v46, %v2425_v41 }
 0x747   :  { %v598_v49 = vpack.c.bf16 %v2762_v47, %v2762_v47 }
 0x749   :  { %2229 = vmatmul.mubr.msk.bf16.vlgmr.msra.gmra.mrb[16].mxu1 %vm221_vm3, %v598_v49 }
 0x74a   :  { %2239 = vmatpush3.bf16.xpose.msra.mxu1 %v705_v50  ;;  %2240 = vmatprep.mubr.msk.bf16.mxu1 %vm2491_vm0, %v2490_v2 }
 0x74b   :  { %2250 = vmatprep.subr.bf16.mxu1 %v2490_v2 }
 0x751   :  { %2241 = vmatmul.mubr.msk.bf16.vlgmr.msra.gmra.mrb[20].mxu1 %vm221_vm3, %v698_v51 }
 0x752   :  { %2252 = vmatprep.mubr.msk.bf16.mxu1 %vm2491_vm0, %v2490_v2  ;;  %2251 = vmatpush3.bf16.msra.mxu1 %v2830_v31 }
 0x753   :  { %2262 = vmatprep.subr.bf16.mxu1 %v2490_v2 }
 0x81c   :  { %v641_v54 = vpop.f32.mrb[16].mxu1 }
 0x81d   :  { %v647_v55 = vpack.c.bf16 %v641_v54, %v641_v54  ;;  %v2230_v56 = vpop.f32.mrb[17].mxu1 }
 0x81e   :  { %v644_v57 = vpop.f32.mrb[18].mxu1 }
 0x81f   :  { %v2231_v58 = vpop.f32.mrb[19].mxu1  ;;  %2235 = vmatmul.mubr.msk.bf16.vlgmr.msra.gmra.mrb[20].mxu0 %vm221_vm3, %v647_v55 }
 0x820   :  { %2246 = vmatprep.mubr.msk.bf16.mxu0 %vm2491_vm0, %v2490_v2 }
 0x824   :  { %v741_v60 = vpop.f32.mrb[20].mxu1 }
 0x825   :  { %v2242_v61 = vpop.f32.mrb[21].mxu1  ;;  %v747_v62 = vsel %vm221_vm3, %v741_v60, -inf }
 0x826   :  { %748 = vmax.xlane.f32.xlu0 %v747_v62  ;;  %v744_v63 = vpop.f32.mrb[22].mxu1 }
 0x827   :  { %v2243_v1 = vpop.f32.mrb[23].mxu1 }
 0x83c   :  { %759 = vrot.lane.b32.xlu0 %v2672_v27, %s2502_s27  ;;  %v2799_v27 = vrot.slane %v2674_v28, 4 }
 0x840   :  { %986 = vrot.lane.b32.xlu0 %v2789_v3, %s2494_s24 }
 0x8b3   :  { %v749_v5 = vpop.xlane.xlu0 %748 }
 0x8b4   :  { %v750_v7 = vsub.f32 %v741_v60, %v749_v5 }
 0x8b6   :  { %v751_v8 = vmul.f32 1.442695, %v750_v7 }
 0x8b7   :  { %v760_v9 = vpop.permute.xlu0 %759 }
 0x8b8   :  { %2428 = vpow2.f32 %v751_v8  ;;  %v765_v10 = vsel %vm285_vm4, %v760_v9, 0 }
 0x8b9   :  { %2245 = vmatpush3.bf16.msra.mxu0 %v765_v10 }
 0x8ba   :  { %2256 = vmatprep.subr.bf16.mxu0 %v2490_v2 }
 0x8bb   :  { %v987_v25 = vpop.permute.xlu0 %986 }
 0x8bc   :  { %v992_v26 = vsel %vm221_vm3, %v987_v25, 0 }
 0x8c2   :  { %v2429_v11 = vpop.eup %2428 }
 0x8c3   :  { %v753_v12 = vsel %vm221_vm3, %v2429_v11, 0.0 }
 0x8c4   :  { %754 = vadd.xlane.f32.xlu1 %v753_v12 }
 0x8d5   :  { %875 = vrot.lane.b32.xlu1 %v2789_v3, %s2492_s20 }
 0x8d9   :  { %984 = vrot.lane.b32.xlu1 %v2799_v27, %s2493_s5 }
 0x8f2   :  { %v690_v13 = vpop.f32.mrb[20].mxu0 }
 0x8f3   :  { %v2804_v14 = vadd.f32 %v690_v13, %v2750_v29  ;;  %v2236_v17 = vpop.f32.mrb[21].mxu0 }
 0x8f4   :  { %v693_v18 = vpop.f32.mrb[22].mxu0 }
 0x8f5   :  { %v2237_v19 = vpop.f32.mrb[23].mxu0 }
 0x951   :  { %v755_v20 = vpop.xlane.xlu1 %754 }
 0x952   :  { %2430 = vrcp.f32 %v755_v20 }
 0x955   :  { %v876_v23 = vpop.permute.xlu1 %875 }
 0x956   :  { %v881_v24 = vsel %vm221_vm3, %v876_v23, 0 }
 0x959   :  { %v985_v29 = vpop.permute.xlu1 %984 }
 0x95c   :  { %v2431_v21 = vpop.eup %2430 }
 0x95d   :  { %v2806_v22 = vmul.f32 %v2431_v21, %v2429_v11 }
 0x95f   :  { %v758_v28 = vpack.c.bf16 %v2806_v22, %v2806_v22 }
 0x961   :  { %2247 = vmatmul.mubr.msk.bf16.vlgmr.msra.gmra.mrb[24].mxu0 %vm221_vm3, %v758_v28 }
 0x962   :  { %2257 = vmatpush3.bf16.xpose.msra.mxu0 %v881_v24  ;;  %2258 = vmatprep.mubr.msk.bf16.mxu0 %vm2491_vm0, %v2490_v2 }
 0x963   :  { %2268 = vmatprep.subr.bf16.mxu0 %v2490_v2 }
 0x969   :  { %2259 = vmatmul.mubr.msk.bf16.vlgmr.msra.gmra.mrb[28].mxu0 %vm221_vm3, %v2799_v27 }
 0x96a   :  { %2269 = vmatpush3.bf16.xpose.msra.mxu0 %v992_v26  ;;  %2270 = vmatprep.mubr.msk.bf16.mxu0 %vm2491_vm0, %v2490_v2 }
 0x96b   :  { %2280 = vmatprep.subr.bf16.mxu0 %v2490_v2 }
 0x971   :  { %2271 = vmatmul.mubr.msk.bf16.vlgmr.msra.gmra.mrb[32].mxu0 %vm221_vm3, %v985_v29 }
 0x972   :  { %2281 = vmatpush3.bf16.msra.mxu0 %v2734_v6  ;;  %2282 = vmatprep.mubr.msk.bf16.mxu0 %vm2491_vm0, %v2490_v2 }
 0x973   :  { %2292 = vmatprep.subr.bf16.mxu0 %v2490_v2 }
 0xa34   :  { %v801_v32 = vpop.f32.mrb[24].mxu0 }
 0xa35   :  { %v807_v33 = vpack.c.bf16 %v801_v32, %v801_v32  ;;  %v2248_v34 = vpop.f32.mrb[25].mxu0 }
 0xa36   :  { %v804_v6 = vpop.f32.mrb[26].mxu0 }
 0xa37   :  { %v2249_v35 = vpop.f32.mrb[27].mxu0  ;;  %2253 = vmatmul.mubr.msk.bf16.vlgmr.msra.gmra.mrb[24].mxu1 %vm221_vm3, %v807_v33 }
 0xa38   :  { %2264 = vmatprep.mubr.msk.bf16.mxu1 %vm2491_vm0, %v2490_v2 }
 0xa3c   :  { %v917_v36 = vpop.f32.mrb[28].mxu0 }
 0xa3d   :  { %v2260_v37 = vpop.f32.mrb[29].mxu0  ;;  %v923_v38 = vsel %vm221_vm3, %v917_v36, -inf }
 0xa3e   :  { %924 = vmax.xlane.f32.xlu0 %v923_v38  ;;  %v920_v39 = vpop.f32.mrb[30].mxu0 }
 0xa3f   :  { %v2261_v40 = vpop.f32.mrb[31].mxu0 }
 0xa44   :  { %v1028_v41 = vpop.f32.mrb[32].mxu0 }
 0xa45   :  { %v2272_v42 = vpop.f32.mrb[33].mxu0  ;;  %v1034_v43 = vsel %vm221_vm3, %v1028_v41, -inf }
 0xa46   :  { %1035 = vmax.xlane.f32.xlu1 %v1034_v43  ;;  %v1031_v44 = vpop.f32.mrb[34].mxu0 }
 0xa47   :  { %v2273_v45 = vpop.f32.mrb[35].mxu0 }
 0xa57   :  { %935 = vrot.lane.b32.xlu1 %v2789_v3, %s2495_s6 }
 0xa5b   :  { %1183 = vrot.lane.b32.xlu1 %v2789_v3, %s2498_s2 }
 0xa5f   :  { %1181 = vrot.lane.b32.xlu1 %v2799_v27, %s2497_s26 }
 0xacb   :  { %v925_v46 = vpop.xlane.xlu0 %924 }
 0xacc   :  { %v926_v48 = vsub.f32 %v917_v36, %v925_v46 }
 0xace   :  { %v927_v49 = vmul.f32 1.442695, %v926_v48 }
 0xad0   :  { %2432 = vpow2.f32 %v927_v49 }
 0xad3   :  { %v1036_v50 = vpop.xlane.xlu1 %1035 }
 0xad4   :  { %v1037_v51 = vsub.f32 %v1028_v41, %v1036_v50 }
 0xad6   :  { %v1038_v52 = vmul.f32 1.442695, %v1037_v51 }
 0xad7   :  { %v936_v54 = vpop.permute.xlu1 %935 }
 0xad8   :  { %2434 = vpow2.f32 %v1038_v52  ;;  %v941_v55 = vsel %vm285_vm4, %v936_v54, 0 }
 0xad9   :  { %2263 = vmatpush3.bf16.msra.mxu1 %v941_v55 }
 0xada   :  { %v2433_v56 = vpop.eup %2432  ;;  %2274 = vmatprep.subr.bf16.mxu1 %v2490_v2 }
 0xadb   :  { %v929_v57 = vsel %vm221_vm3, %v2433_v56, 0.0  ;;  %v1184_v24 = vpop.permute.xlu1 %1183 }
 0xadc   :  { %930 = vadd.xlane.f32.xlu0 %v929_v57  ;;  %v1189_v30 = vsel %vm221_vm3, %v1184_v24, 0 }
 0xadf   :  { %v1182_v33 = vpop.permute.xlu1 %1181 }
 0xae2   :  { %v2435_v58 = vpop.eup %2434 }
 0xae3   :  { %v1040_v60 = vsel %vm221_vm3, %v2435_v58, 0.0 }
 0xae4   :  { %1041 = vadd.xlane.f32.xlu0 %v1040_v60 }
 0xafa   :  { %1046 = vrot.lane.b32.xlu0 %v2789_v3, %s2496_s25 }
 0xb0a   :  { %v850_v61 = vpop.f32.mrb[24].mxu1 }
 0xb0b   :  { %v2852_v62 = vadd.f32 %v850_v61, %v2804_v14  ;;  %v2254_v63 = vpop.f32.mrb[25].mxu1 }
 0xb0c   :  { %v853_v1 = vpop.f32.mrb[26].mxu1 }
 0xb0d   :  { %v2255_v5 = vpop.f32.mrb[27].mxu1 }
 0xb69   :  { %v931_v7 = vpop.xlane.xlu0 %930 }
 0xb6a   :  { %2436 = vrcp.f32 %v931_v7  ;;  %v2070_v7 = vld [vmem:[%s3071_s8] ss:$0 sm:$0xff] }
 0xb71   :  { %v1042_v8 = vpop.xlane.xlu0 %1041 }
 0xb72   :  { %2438 = vrcp.f32 %v1042_v8 }
 0xb74   :  { %v2437_v9 = vpop.eup %2436 }
 0xb75   :  { %v2854_v10 = vmul.f32 %v2437_v9, %v2433_v56  ;;  %v1047_v11 = vpop.permute.xlu0 %1046 }
 0xb76   :  { %v1052_v13 = vsel %vm285_vm4, %v1047_v11, 0 }
 0xb77   :  { %v934_v12 = vpack.c.bf16 %v2854_v10, %v2854_v10 }
 0xb79   :  { %2265 = vmatmul.mubr.msk.bf16.vlgmr.msra.gmra.mrb[28].mxu1 %vm221_vm3, %v934_v12 }
 0xb7a   :  { %2275 = vmatpush3.bf16.msra.mxu1 %v1052_v13  ;;  %2276 = vmatprep.mubr.msk.bf16.mxu1 %vm2491_vm0, %v2490_v2 }
 0xb7b   :  { %2286 = vmatprep.subr.bf16.mxu1 %v2490_v2 }
 0xb7c   :  { %v2439_v14 = vpop.eup %2438 }
 0xb7d   :  { %v2863_v17 = vmul.f32 %v2439_v14, %v2435_v58 }
 0xb7f   :  { %v1045_v18 = vpack.c.bf16 %v2863_v17, %v2863_v17 }
 0xb81   :  { %2277 = vmatmul.mubr.msk.bf16.vlgmr.msra.gmra.mrb[32].mxu1 %vm221_vm3, %v1045_v18 }
 0xb82   :  { %2287 = vmatpush3.bf16.msra.mxu1 %v2727_v4  ;;  %2288 = vmatprep.mubr.msk.bf16.mxu1 %vm2491_vm0, %v2490_v2 }
 0xb83   :  { %2298 = vmatprep.subr.bf16.mxu1 %v2490_v2 }
 0xc4c   :  { %v977_v19 = vpop.f32.mrb[28].mxu1 }
 0xc4d   :  { %v983_v20 = vpack.c.bf16 %v977_v19, %v977_v19  ;;  %v2266_v21 = vpop.f32.mrb[29].mxu1 }
 0xc4e   :  { %v980_v23 = vpop.f32.mrb[30].mxu1 }
 0xc4f   :  { %v2267_v28 = vpop.f32.mrb[31].mxu1  ;;  %2289 = vmatmul.mubr.msk.bf16.vlgmr.msra.gmra.mrb[36].mxu1 %vm221_vm3, %v983_v20 }
 0xc50   :  { %2300 = vmatprep.mubr.msk.bf16.mxu1 %vm2491_vm0, %v2490_v2 }
 0xc54   :  { %v1088_v25 = vpop.f32.mrb[32].mxu1 }
 0xc55   :  { %v1094_v26 = vpack.c.bf16 %v1088_v25, %v1088_v25  ;;  %v2278_v29 = vpop.f32.mrb[33].mxu1 }
 0xc56   :  { %v1091_v4 = vpop.f32.mrb[34].mxu1 }
 0xc57   :  { %v2279_v32 = vpop.f32.mrb[35].mxu1  ;;  %2283 = vmatmul.mubr.msk.bf16.vlgmr.msra.gmra.mrb[36].mxu0 %vm221_vm3, %v1094_v26 }
 0xc58   :  { %2293 = vmatpush3.bf16.xpose.msra.mxu0 %v1189_v30  ;;  %2294 = vmatprep.mubr.msk.bf16.mxu0 %vm2491_vm0, %v2490_v2 }
 0xc59   :  { %2304 = vmatprep.subr.bf16.mxu0 %v2490_v2 }
 0xc5f   :  { %2295 = vmatmul.mubr.msk.bf16.vlgmr.msra.gmra.mrb[40].mxu0 %vm221_vm3, %v1182_v33 }
 0xc60   :  { %2305 = vmatpush3.bf16.msra.mxu0 %v2778_v53  ;;  %2306 = vmatprep.mubr.msk.bf16.mxu0 %vm2491_vm0, %v2490_v2 }
 0xc61   :  { %2316 = vmatprep.subr.bf16.mxu0 %v2490_v2 }
 0xd22   :  { %v1175_v34 = vpop.f32.mrb[36].mxu1 }
 0xd23   :  { %v2290_v6 = vpop.f32.mrb[37].mxu1 }
 0xd24   :  { %v1178_v35 = vpop.f32.mrb[38].mxu1 }
 0xd25   :  { %v2291_v36 = vpop.f32.mrb[39].mxu1 }
 0xd2a   :  { %v1132_v37 = vpop.f32.mrb[36].mxu0 }
 0xd2b   :  { %v2885_v38 = vadd.f32 %v1175_v34, %v1132_v37  ;;  %v2284_v39 = vpop.f32.mrb[37].mxu0 }
 0xd2c   :  { %v1135_v40 = vpop.f32.mrb[38].mxu0 }
 0xd2d   :  { %v2285_v41 = vpop.f32.mrb[39].mxu0 }
 0xd32   :  { %v1225_v42 = vpop.f32.mrb[40].mxu0 }
 0xd33   :  { %v2296_v43 = vpop.f32.mrb[41].mxu0  ;;  %v1231_v44 = vsel %vm221_vm3, %v1225_v42, -inf }
 0xd34   :  { %1232 = vmax.xlane.f32.xlu0 %v1231_v44  ;;  %v1228_v53 = vpop.f32.mrb[42].mxu0 }
 0xd35   :  { %v2297_v45 = vpop.f32.mrb[43].mxu0 }
 0xd4a   :  { %1243 = vrot.lane.b32.xlu0 %v2789_v3, %s2501_s0 }
 0xd4e   :  { %1336 = vrot.lane.b32.xlu0 %v2799_v27, %s2500_s4 }
 0xdc1   :  { %v1233_v46 = vpop.xlane.xlu0 %1232 }
 0xdc2   :  { %v1234_v48 = vsub.f32 %v1225_v42, %v1233_v46 }
 0xdc4   :  { %v1235_v49 = vmul.f32 1.442695, %v1234_v48 }
 0xdc5   :  { %v1244_v50 = vpop.permute.xlu0 %1243 }
 0xdc6   :  { %2440 = vpow2.f32 %v1235_v49  ;;  %v1249_v51 = vsel %vm285_vm4, %v1244_v50, 0 }
 0xdc7   :  { %2299 = vmatpush3.bf16.msra.mxu1 %v1249_v51 }
 0xdc8   :  { %2310 = vmatprep.subr.bf16.mxu1 %v2490_v2 }
 0xdc9   :  { %v1337_v61 = vpop.permute.xlu0 %1336 }
 0xdd0   :  { %v2441_v52 = vpop.eup %2440 }
 0xdd1   :  { %v1237_v54 = vsel %vm221_vm3, %v2441_v52, 0.0 }
 0xdd2   :  { %1238 = vadd.xlane.f32.xlu1 %v1237_v54 }
 0xde3   :  { %1338 = vrot.lane.b32.xlu1 %v2789_v3, %s2499_s30 }
 0xe5f   :  { %v1239_v55 = vpop.xlane.xlu1 %1238 }
 0xe60   :  { %2442 = vrcp.f32 %v1239_v55 }
 0xe63   :  { %v1339_v57 = vpop.permute.xlu1 %1338 }
 0xe64   :  { %v1344_v60 = vsel %vm221_vm3, %v1339_v57, 0 }
 0xe6a   :  { %v2443_v27 = vpop.eup %2442 }
 0xe6b   :  { %v2897_v56 = vmul.f32 %v2443_v27, %v2441_v52 }
 0xe6d   :  { %v1242_v58 = vpack.c.bf16 %v2897_v56, %v2897_v56 }
 0xe6f   :  { %2301 = vmatmul.mubr.msk.bf16.vlgmr.msra.gmra.mrb[40].mxu1 %vm221_vm3, %v1242_v58 }
 0xe70   :  { %2311 = vmatpush3.bf16.xpose.msra.mxu1 %v1344_v60  ;;  %2312 = vmatprep.mubr.msk.bf16.mxu1 %vm2491_vm0, %v2490_v2  ;;  %v2403_v60 = vld [vmem:[%s3074_s11] sm:$0xff]  }
 0xe71   :  { %2322 = vmatprep.subr.bf16.mxu1 %v2490_v2 }
 0xe77   :  { %2313 = vmatmul.mubr.msk.bf16.vlgmr.msra.gmra.mrb[44].mxu1 %vm221_vm3, %v1337_v61  ;;  %v2405_v61 = vld [vmem:[%s3076_s13] sm:$0xff]  }
 0xe78   :  { %2323 = vmatpush3.bf16.msra.mxu1 %v2830_v31  ;;  %2324 = vmatprep.mubr.msk.bf16.mxu1 %vm2491_vm0, %v2490_v2  ;;  %v1515_v31 = vadd.f32 %v2070_v7, %v2852_v62 }
 0xe79   :  { %2336 = vmatprep.subr.bf16.mxu1 %v2490_v2 }
 0xe7a   :  { %v1517_v14 = vadd.f32 %v1515_v31, %v2660_v15 }
 0xe7c   :  { %v1521_v20 = vsel %vm169_vm2, %v1517_v14, 0.0 }
 0xf42   :  { %v1285_v63 = vpop.f32.mrb[40].mxu1 }
 0xf43   :  { %v1291_v1 = vpack.c.bf16 %v1285_v63, %v1285_v63  ;;  %v2302_v5 = vpop.f32.mrb[41].mxu1  ;;  %v2406_v63 = vld [vmem:[%s3076_s13 + $0x8] sm:$0xff]  }
 0xf44   :  { %v1288_v8 = vpop.f32.mrb[42].mxu1 }
 0xf45   :  { %v2303_v9 = vpop.f32.mrb[43].mxu1  ;;  %2307 = vmatmul.mubr.msk.bf16.vlgmr.msra.gmra.mrb[44].mxu0 %vm221_vm3, %v1291_v1 }
 0xf46   :  { %2318 = vmatprep.mubr.msk.bf16.mxu0 %vm2491_vm0, %v2490_v2 }
 0xf4a   :  { %v1380_v11 = vpop.f32.mrb[44].mxu1 }
 0xf4b   :  { %v2314_v12 = vpop.f32.mrb[45].mxu1  ;;  %v1386_v13 = vsel %vm221_vm3, %v1380_v11, -inf }
 0xf4c   :  { %1387 = vmax.xlane.f32.xlu1 %v1386_v13  ;;  %v1383_v18 = vpop.f32.mrb[46].mxu1  ;;  %v2071_v13 = vld [vmem:[%s3072_s9] ss:$0 sm:$0xff] }
 0xf4d   :  { %v2315_v19 = vpop.f32.mrb[47].mxu1 }
 0xf50   :  { %1522 = vadd.xlane.f32.xlu1 %v1521_v20  ;;  %v2072_v20 = vld [vmem:[%s3073_s10] ss:$0 sm:$0xff] }
 0xfd9   :  { %v1388_v21 = vpop.xlane.xlu1 %1387 }
 0xfda   :  { %v1389_v23 = vsub.f32 %v1380_v11, %v1388_v21 }
 0xfdc   :  { %v1390_v28 = vmul.f32 1.442695, %v1389_v23 }
 0xfdd   :  { %v1523_v40 = vpop.xlane.xlu1 %1522 }
 0xfde   :  { %2444 = vpow2.f32 %v1390_v28  ;;  %v1528_v41 = vmul.f32 0.03125, %v1523_v40 }
 0xfe0   :  { %v1530_v45 = vsub.f32 %v1517_v14, %v1528_v41 }
 0xfe2   :  { %v1532_v51 = vmul.f32 %v1530_v45, %v1530_v45 }
 0xfe4   :  { %v1534_v52 = vsel %vm169_vm2, %v1532_v51, 0.0 }
 0xfe8   :  { %v2445_v24 = vpop.eup %2444 }
 0xfe9   :  { %v1392_v25 = vsel %vm221_vm3, %v2445_v24, 0.0 }
 0xfea   :  { %1393 = vadd.xlane.f32.xlu0 %v1392_v25  ;;  %v2407_v25 = vld [vmem:[%s3076_s13 + $0x10] sm:$0xff]  }
0x1000   :  { %1398 = vrot.lane.b32.xlu0 %v2789_v3, %s2502_s27 }
0x1018   :  { %v1329_v62 = vpop.f32.mrb[44].mxu0 }
0x1019   :  { %v1335_v15 = vadd.f32 %v1329_v62, %v2885_v38  ;;  %v2308_v26 = vpop.f32.mrb[45].mxu0  ;;  %v2408_v62 = vld [vmem:[%s3076_s13 + $0x18] sm:$0xff]  }
0x101a   :  { %v1332_v29 = vpop.f32.mrb[46].mxu0  ;;  %v2410_v26 = vld [vmem:[%s3076_s13 + $0x28] sm:$0xff]  }
0x101b   :  { %v2309_v4 = vpop.f32.mrb[47].mxu0  ;;  %v2411_v29 = vld [vmem:[%s3076_s13 + $0x30] sm:$0xff]  }
0x101c   :  { %v2412_v4 = vld [vmem:[%s3076_s13 + $0x38] sm:$0xff]  }
0x1077   :  { %v1394_v30 = vpop.xlane.xlu0 %1393 }
0x1078   :  { %2446 = vrcp.f32 %v1394_v30  ;;  %v2073_v30 = vld [vmem:[%s3075_s12] ss:$0 sm:$0xff] }
0x107b   :  { %v1399_v32 = vpop.permute.xlu0 %1398 }
0x107c   :  { %v1404_v33 = vsel %vm285_vm4, %v1399_v32, 0 }
0x107d   :  { %2317 = vmatpush3.bf16.msra.mxu0 %v1404_v33 }
0x107e   :  { %2328 = vmatprep.subr.bf16.mxu0 %v2490_v2 }
0x1082   :  { %v2447_v34 = vpop.eup %2446 }
0x1083   :  { %v2927_v6 = vmul.f32 %v2447_v34, %v2445_v24 }
0x1085   :  { %v1397_v3 = vpack.c.bf16 %v2927_v6, %v2927_v6 }
0x1087   :  { %2319 = vmatmul.mubr.msk.bf16.vlgmr.msra.gmra.mrb[48].mxu0 %vm221_vm3, %v1397_v3 }
0x1088   :  { %2332 = vmatprep.mubr.msk.bf16.mxu0 %vm2491_vm0, %v2490_v2  ;;  %2329 = vmatpush3.bf16.msra.mxu0 %v2403_v60 }
0x1089   :  { %2330 = vmatprep.subr.bf16.mxu0 %v2490_v2 }
0x115a   :  { %v1440_v35 = vpop.f32.mrb[48].mxu0 }
0x115b   :  { %v1446_v36 = vpack.c.bf16 %v1440_v35, %v1440_v35  ;;  %v2320_v37 = vpop.f32.mrb[49].mxu0 }
0x115c   :  { %v1443_v38 = vpop.f32.mrb[50].mxu0 }
0x115d   :  { %v2321_v39 = vpop.f32.mrb[51].mxu0  ;;  %2325 = vmatmul.mubr.msk.bf16.vlgmr.msra.gmra.mrb[48].mxu1 %vm221_vm3, %v1446_v36 }
0x115e   :  { %2352 = vmatprep.mubr.msk.bf16.mxu1 %vm2491_vm0, %v2490_v2  ;;  %2337 = vmatpush3.bf16.msra.mxu1 %v2405_v61 }
0x115f   :  { %2338 = vmatprep.subr.bf16.mxu1 %v2490_v2 }
0x1162   :  { %2339 = vmatpush3.bf16.msra.mxu1 %v2406_v63 }
0x1163   :  { %2340 = vmatprep.subr.bf16.mxu1 %v2490_v2 }
0x1166   :  { %2341 = vmatpush3.bf16.msra.mxu1 %v2407_v25 }
0x1167   :  { %2342 = vmatprep.subr.bf16.mxu1 %v2490_v2 }
0x116a   :  { %2343 = vmatpush3.bf16.msra.mxu1 %v2408_v62 }
0x116b   :  { %2344 = vmatprep.subr.bf16.mxu1 %v2490_v2 }
0x1230   :  { %v1484_v42 = vpop.f32.mrb[48].mxu1 }
0x1231   :  { %v1490_v43 = vadd.f32 %v1484_v42, %v1335_v15  ;;  %v2326_v44 = vpop.f32.mrb[49].mxu1  ;;  %v2409_v15 = vld [vmem:[%s3076_s13 + $0x20] sm:$0xff]  }
0x1232   :  { %v1487_v53 = vpop.f32.mrb[50].mxu1  ;;  %2345 = vmatpush3.bf16.msra.mxu1 %v2409_v15 }
0x1233   :  { %v1516_v46 = vadd.f32 %v2070_v7, %v1490_v43  ;;  %v2327_v48 = vpop.f32.mrb[51].mxu1  ;;  %2346 = vmatprep.subr.bf16.mxu1 %v2490_v2 }
0x1234   :  { %v2077_v48 = vld [vmem:[%s3077_s14] ss:$0 sm:$0xff]  ;;  %s2503_s14 = smov 8  }
0x1235   :  { %v1518_v49 = vadd.f32 %v1516_v46, %v2662_v16  ;;  %v2404_v16 = vld [vmem:[%s3074_s11 + $0x8] sm:$0xff]  }
0x1236   :  { %2331 = vmatpush3.bf16.msra.mxu0 %v2404_v16  ;;  %2347 = vmatpush3.bf16.msra.mxu1 %v2410_v26 }
0x1237   :  { %v1524_v50 = vsel %vm169_vm2, %v1518_v49, 0.0  ;;  %2348 = vmatprep.subr.bf16.mxu1 %v2490_v2 }
0x1238   :  { %1525 = vadd.xlane.f32.xlu1 %v1524_v50 }
0x123a   :  { %2349 = vmatpush3.bf16.msra.mxu1 %v2411_v29 }
0x123b   :  { %2350 = vmatprep.subr.bf16.mxu1 %v2490_v2 }
0x123c   :  { %1535 = vadd.xlane.f32.xlu1 %v1534_v52 }
0x123e   :  { %2351 = vmatpush3.bf16.msra.mxu1 %v2412_v4  ;;  %v2087_v4 = vld [vmem:[%s3079_s16] ss:$0 sm:$0xff] }
0x12c5   :  { %v1526_v54 = vpop.xlane.xlu1 %1525 }
0x12c6   :  { %v1529_v55 = vmul.f32 0.03125, %v1526_v54 }
0x12c8   :  { %v1531_v27 = vsub.f32 %v1518_v49, %v1529_v55 }
0x12c9   :  { %v1536_v1 = vpop.xlane.xlu1 %1535 }
0x12ca   :  { %v1533_v57 = vmul.f32 %v1531_v27, %v1531_v27  ;;  %v1540_v5 = vmul.f32 0.03125, %v1536_v1 }
0x12cc   :  { %v1537_v58 = vsel %vm169_vm2, %v1533_v57, 0.0  ;;  %v1542_v7 = vadd.f32 1e-05, %v1540_v5 }
0x12cd   :  { %1538 = vadd.xlane.f32.xlu1 %v1537_v58 }
0x12ce   :  { %2448 = vrsqrt.f32 %v1542_v7 }
0x12d8   :  { %v2449_v11 = vpop.eup %2448 }
0x12d9   :  { %v1546_v12 = vmul.f32 %v2449_v11, %v1530_v45 }
0x12db   :  { %v1554_v18 = vmul.f32 %v2071_v13, %v1546_v12  ;;  %v2506_v12 = vmov 0.0|0.0  }
0x12dc   :  { %2377 = vmatprep.subr.bf16.mxu0 %v2506_v12 }
0x12dd   :  { %v1562_v23 = vadd.f32 %v2072_v20, %v1554_v18 }
0x135a   :  { %v1539_v8 = vpop.xlane.xlu1 %1538 }
0x135b   :  { %v1541_v9 = vmul.f32 0.03125, %v1539_v8 }
0x135d   :  { %v1543_v31 = vadd.f32 1e-05, %v1541_v9 }
0x135f   :  { %2450 = vrsqrt.f32 %v1543_v31 }
0x1369   :  { %v2451_v14 = vpop.eup %2450 }
0x136a   :  { %v1547_v19 = vmul.f32 %v2451_v14, %v1531_v27 }
0x136c   :  { %v1555_v21 = vmul.f32 %v2071_v13, %v1547_v19 }
0x136e   :  { %v1563_v28 = vadd.f32 %v2072_v20, %v1555_v21 }
0x1370   :  { %v1564_v24 = vpack.c.bf16 %v1563_v28, %v1562_v23 }
0x1372   :  { %2333 = vmatmul.mubr.msk.bf16.vlgmr.msra.gmra.mrb[52].mxu0 %vm169_vm2, %v1564_v24 }
0x1373   :  { %2360 = vmatprep.mubr.msk.f32.mxu0 %vm2491_vm0, %v2490_v2 }
0x1445   :  { %v1625_v32 = vpop.f32.mrb[52].mxu0 }
0x1446   :  { %v1626_v33 = vadd.f32 %v2073_v30, %v1625_v32  ;;  %v2334_v34 = vpop.f32.mrb[53].mxu0 }
0x1447   :  { %v1628_v3 = vpop.f32.mrb[54].mxu0 }
0x1448   :  { %v1635_v35 = vmul.f32 0.70710677, %v1626_v33  ;;  %v1629_v36 = vadd.f32 %v2073_v30, %v1628_v3  ;;  %v2335_v37 = vpop.f32.mrb[55].mxu0  ;;  %v1632_v42 = vmul.f32 0.5, %v1626_v33 }
0x1449   :  { %v2413_v37 = vld [vmem:[%s3080_s17] sm:$0xff]  }
0x144a   :  { %2452 = verf.f32 %v1635_v35  ;;  %v1636_v38 = vmul.f32 0.70710677, %v1629_v36  ;;  %v1633_v43 = vmul.f32 0.5, %v1629_v36  ;;  %v1802_v36 = vld [vmem:[%s3101_s23] sm:$0x3] }
0x144c   :  { %2454 = verf.f32 %v1636_v38  ;;  %v2414_v38 = vld [vmem:[%s3080_s17 + $0x8] sm:$0xff]   ;;  %s2507_s17 = smov [#allocation3]  }
0x1454   :  { %v2453_v39 = vpop.eup %2452 }
0x1455   :  { %v1639_v40 = vadd.f32 1.0, %v2453_v39 }
0x1456   :  { %v2455_v41 = vpop.eup %2454 }
0x1457   :  { %v1640_v44 = vadd.f32 1.0, %v2455_v41  ;;  %v1641_v53 = vmul.f32 %v1639_v40, %v1632_v42  ;;  %v2415_v42 = vld [vmem:[%s3082_s19] sm:$0xff]   ;;  %s2022_s19 = sshll.u32 %s2507_s17, 4  ;;  %s2023_s19 = int_to_ptr.vmem [resolvable:$true] %s2022_s19 }
0x1458   :  { %s2466_s24 = scalar_lea.vmem %s2023_s19, 256  ;;  %p2471_p1 = scmp.lt.s32.totalorder %s2023_s19, %s2023_s19 }
0x1459   :  { %v1642_v45 = vmul.f32 %v1640_v44, %v1633_v43  ;;  %v2089_v43 = vld [vmem:[%s3081_s18] ss:$0 sm:$0xff]  ;;  %p2467_p0 = scmp.ne.s32.totalorder %s2023_s19, %s2466_s24  ;;  %p2472_p2 = scmp.lt.s32.totalorder %s2466_s24, %s2466_s24 }
0x145b   :  { %v1643_v46 = vpack.c.bf16 %v1642_v45, %v1641_v53  ;;  %p2473_p3 = por %p2472_p2, %p2471_p1 }
0x145d   :  { %2353 = vmatmul.mubr.bf16.vlgmr.msra.gmra.mrb[52].mxu1 %v1643_v46  ;;  %p2474_p4 = pnand %p2473_p3, %p2467_p0 }
0x1530   :  { %v1749_v49 = vpop.f32.mrb[52].mxu1 }
0x1531   :  { %v1750_v50 = vadd.f32 %v2077_v48, %v1749_v49  ;;  %v2354_v51 = vpop.f32.mrb[53].mxu1 }
0x1532   :  { %v1752_v52 = vpop.f32.mrb[54].mxu1 }
0x1533   :  { %v1753_v54 = vadd.f32 %v2077_v48, %v1752_v52  ;;  %v2355_v55 = vpop.f32.mrb[55].mxu1  ;;  %v1756_v27 = vadd.f32 %v1750_v50, %v1562_v23 }
0x1535   :  { %v1760_v57 = vsel %vm169_vm2, %v1756_v27, 0.0  ;;  %v1757_v58 = vadd.f32 %v1753_v54, %v1563_v28 }
0x1536   :  { %1761 = vadd.xlane.f32.xlu1 %v1760_v57 }
0x1537   :  { %v1763_v60 = vsel %vm169_vm2, %v1757_v58, 0.0 }
0x153a   :  { %1764 = vadd.xlane.f32.xlu1 %v1763_v60 }
0x15c3   :  { %v1762_v16 = vpop.xlane.xlu1 %1761 }
0x15c4   :  { %v1766_v61 = vmul.f32 0.03125, %v1762_v16 }
0x15c6   :  { %v1768_v63 = vsub.f32 %v1756_v27, %v1766_v61 }
0x15c7   :  { %v1765_v1 = vpop.xlane.xlu1 %1764 }
0x15c8   :  { %v1767_v5 = vmul.f32 0.03125, %v1765_v1  ;;  %v1770_v7 = vmul.f32 %v1768_v63, %v1768_v63 }
0x15ca   :  { %v1769_v8 = vsub.f32 %v1757_v58, %v1767_v5  ;;  %v1772_v9 = vsel %vm169_vm2, %v1770_v7, 0.0 }
0x15cb   :  { %1773 = vadd.xlane.f32.xlu0 %v1772_v9 }
0x15cc   :  { %v1771_v31 = vmul.f32 %v1769_v8, %v1769_v8 }
0x15ce   :  { %v1775_v11 = vsel %vm169_vm2, %v1771_v31, 0.0 }
0x15cf   :  { %1776 = vadd.xlane.f32.xlu1 %v1775_v11 }
0x15e0   :  { %858 = vrot.lane.b32.xlu1 %v2716_v0, %s2503_s14 }
0x15e1   :  { %1496 = vrot.lane.b32.xlu0 %v2897_v56, %s2504_s3 }
0x15e4   :  { %1492 = vrot.lane.b32.xlu1 %v2863_v17, %s2503_s14 }
0x15e8   :  { %862 = vrot.lane.b32.xlu1 %v2762_v47, %s2504_s3 }
0x15ec   :  { %866 = vrot.lane.b32.xlu1 %v2806_v22, %s2505_s28  ;;  %v2086_v22 = vld [vmem:[%s3078_s15] ss:$0 sm:$0xff] }
0x15f0   :  { %1500 = vrot.lane.b32.xlu1 %v2927_v6, %s2505_s28 }
0x1658   :  { %v1774_v13 = vpop.xlane.xlu0 %1773 }
0x1659   :  { %v1778_v14 = vmul.f32 0.03125, %v1774_v13 }
0x165b   :  { %v1780_v18 = vadd.f32 1e-05, %v1778_v14 }
0x165c   :  { %v1777_v19 = vpop.xlane.xlu1 %1776  ;;  %v1497_v32 = vpop.permute.xlu0 %1496 }
0x165d   :  { %2456 = vrsqrt.f32 %v1780_v18  ;;  %v1779_v0 = vmul.f32 0.03125, %v1777_v19 }
0x165f   :  { %v1781_v20 = vadd.f32 1e-05, %v1779_v0 }
0x1660   :  { %v859_v56 = vpop.permute.xlu1 %858 }
0x1661   :  { %2458 = vrsqrt.f32 %v1781_v20  ;;  %v869_v28 = vsel %vm221_vm3, %v2707_v59, %v859_v56 }
0x1664   :  { %v1493_v21 = vpop.permute.xlu1 %1492 }
0x1665   :  { %v1503_v26 = vsel %vm221_vm3, %v2854_v10, %v1493_v21 }
0x1666   :  { %v1504_v59 = vsel %vm96_vm1, %v1503_v26, %v1497_v32 }
0x1667   :  { %v2457_v17 = vpop.eup %2456 }
0x1668   :  { %v1784_v23 = vmul.f32 %v2457_v17, %v1768_v63  ;;  %v863_v47 = vpop.permute.xlu1 %862 }
0x1669   :  { %v870_v25 = vsel %vm96_vm1, %v869_v28, %v863_v47 }
0x166a   :  { %v1792_v15 = vmul.f32 %v2086_v22, %v1784_v23 }
0x166b   :  { %v2459_v6 = vpop.eup %2458 }
0x166c   :  { %v1785_v24 = vmul.f32 %v2459_v6, %v1769_v8  ;;  %v867_v62 = vpop.permute.xlu1 %866  ;;  %v1800_v34 = vadd.f32 %v2087_v4, %v1792_v15 }
0x166d   :  { %v872_v29 = vsel %vm871_vm5, %v870_v25, %v867_v62 }
0x166e   :  { %1506 = vst.msk [vmem:[#allocation3] sm:$0xff] %vm169_vm2, %v872_v29  ;;  %v1793_v30 = vmul.f32 %v2086_v22, %v1785_v24 }
0x1670   :  { %v1501_v33 = vpop.permute.xlu1 %1500  ;;  %v1801_v3 = vadd.f32 %v2087_v4, %v1793_v30 }
0x1671   :  { %v1505_v35 = vsel %vm871_vm5, %v1504_v59, %v1501_v33 }
0x1672   :  { %1507 = vst.msk [vmem:[#allocation3 + $0x8] sm:$0xff] %vm169_vm2, %v1505_v35  ;;  %v2378_v10 = vpack.c.bf16 %v1801_v3, %v1800_v34 }
0x1674   :  { %2379 = vmatpush3.bf16.msra.mxu0 %v2378_v10 }
0x1675   :  { %2363 = vmatprep.subr.bf16.mxu0 %v2490_v2 }
0x1677   :  { %2361 = vmatmul.mubr.msk.f32.vlgmr.msra.gmra.mrb[56].mxu0 %vm96_vm1, %v1802_v36 }
0x1678   :  { %2364 = vmatpush3.bf16.msra.mxu0 %v2413_v37  ;;  %2367 = vmatprep.mubr.msk.bf16.mxu0 %vm2491_vm0, %v2490_v2 }
0x1679   :  { %2365 = vmatprep.subr.bf16.mxu0 %v2490_v2 }
0x167c   :  { %2366 = vmatpush3.bf16.msra.mxu0 %v2414_v38 }
0x167d   :  { %2371 = vmatprep.subr.bf16.mxu0 %v2490_v2 }
0x174a   :  { %v1872_v39 = vpop.f32.mrb[56].mxu0 }
0x174b   :  { %v1876_v40 = vpack.c.bf16 %v1872_v39, %v1872_v39  ;;  %v2362_v41 = vpop.f32.mrb[57].mxu0 }
0x174d   :  { %2368 = vmatmul.mubr.msk.bf16.vlgmr.msra.gmra.mrb[60].mxu0 %vm169_vm2, %v1876_v40 }
0x174e   :  { %2373 = vmatprep.mubr.msk.bf16.mxu0 %vm2491_vm0, %v2490_v2  ;;  %2372 = vmatpush3.bf16.msra.mxu0 %v2415_v42 }
0x1820   :  { %v1937_v44 = vpop.f32.mrb[60].mxu0 }
0x1821   :  { %v1938_v53 = vadd.f32 %v2089_v43, %v1937_v44  ;;  %v2369_v45 = vpop.f32.mrb[61].mxu0 }
0x1822   :  { %v1940_v46 = vpop.f32.mrb[62].mxu0 }
0x1823   :  { %v1944_v48 = vmul.f32 0.70710677, %v1938_v53  ;;  %v2370_v49 = vpop.f32.mrb[63].mxu0  ;;  %v1943_v51 = vmul.f32 0.5, %v1938_v53 }
0x1825   :  { %2460 = verf.f32 %v1944_v48 }
0x182f   :  { %v2461_v50 = vpop.eup %2460 }
0x1830   :  { %v1946_v52 = vadd.f32 1.0, %v2461_v50 }
0x1832   :  { %v1947_v2 = vmul.f32 %v1946_v52, %v1943_v51 }
0x1834   :  { %v1948_v54 = vpack.c.bf16 %v1947_v2, %v1947_v2 }
0x1836   :  { %2374 = vmatmul.mubr.msk.bf16.vlgmr.msra.gmra.mrb[64].mxu0 %vm96_vm1, %v1948_v54 }
0x1837   :  { %2477 = shalt.err (!%p2474_p4)
}
0x1838   :  { %s2478_s6 = scalar_lea.hbm %s3085_s22, 256 }
0x1839   :  { %p2479_p5 = scmp.ne.s32.totalorder %s3085_s22, %s2478_s6  ;;  %p2482_p6 = scmp.lt.u32.totalorder %s2478_s6, %s3085_s22 }
0x183b   :  { %p2484_p7 = pnand %p2482_p6, %p2479_p5 }
0x183d   :  { %2487 = shalt.err (!%p2484_p7)
}
0x183e   :  { %s2508_s13 = smov 128   ;;  %v2093_v55 = vld [vmem:[#allocation2] ss:$0 sm:$0xff]  ;;  %vm2013_vm6 = vcmask 1024  }
0x183f   :  { %2028 = dma.vmem_to_hbm [thread:$0]  %s2023_s19, 256, %s3085_s22, [#allocation4], %s2508_s13, %s2508_s13, %s2503_s14  }
0x1909   :  { %v2001_v27 = vpop.f32.mrb[64].mxu0 }
0x190a   :  { %v2002_v57 = vadd.f32 %v2093_v55, %v2001_v27  ;;  %v2375_v58 = vpop.f32.mrb[65].mxu0 }
0x190b   :  { %v2004_v60 = vpop.f32.mrb[66].mxu0 }
0x190c   :  { %v2096_v16 = vmul.f32 -1.442695, %v2002_v57  ;;  %v2376_v61 = vpop.f32.mrb[67].mxu0 }
0x190e   :  { %2462 = vpow2.f32 %v2096_v16 }
0x1918   :  { %v2463_v63 = vpop.eup %2462 }
0x1919   :  { %v2010_v1 = vadd.f32 1.0, %v2463_v63 }
0x191b   :  { %2464 = vrcp.f32 %v2010_v1 }
0x1925   :  { %v2465_v5 = vpop.eup %2464 }
0x1926   :  { %2014 = vst.msk [vmem:[%s3084_s21] sm:$0x3] %vm2013_vm6, %v2465_v5 }
0x1927   :  { %2488 = dma.done.wait [#allocation4], 256  }
0x1928   :  { %2489 = vsyncadd [#allocation4], 4294967040 }
0x1929   :  { %2034 = vsyncpa [#allocation4], 1 }

</bundles_post_ra>
